<compile_context>
chip_gen: v7x
topology: tpu7x:2x2x1
jax: 0.10.0
libtpu: 0.0.40
codegen_flags: <defaults>
</compile_context>

<pallas_src>
import functools
import numpy as np
import jax
import jax.numpy as jnp
from jax import lax
from jax.experimental import pallas as pl
from jax.experimental.pallas import tpu as pltpu


# ----------------------------------------------------------------------------
# small in-kernel helpers (value-space zero-padded shifts)
# ----------------------------------------------------------------------------

def _shift_rows(v, d):
    """out[r] = v[r + d] if 0 <= r + d < N else 0.   v: [N, D] value."""
    n = v.shape[0]
    if d == 0:
        return v
    if abs(d) >= n:
        return jnp.zeros_like(v)
    z = jnp.zeros((abs(d),) + v.shape[1:], v.dtype)
    if d > 0:
        return jnp.concatenate([v[d:, :], z], axis=0)
    return jnp.concatenate([z, v[:n + d, :]], axis=0)


def _shift_time3(v, d):
    """out[:, t] = v[:, t + d] if in range else 0.   v: [B, T, C] value."""
    b, t, c = v.shape
    if d == 0:
        return v
    if abs(d) >= t:
        return jnp.zeros_like(v)
    z = jnp.zeros((b, abs(d), c), v.dtype)
    if d > 0:
        return jnp.concatenate([v[:, d:, :], z], axis=1)
    return jnp.concatenate([z, v[:, :t + d, :]], axis=1)


# ----------------------------------------------------------------------------
# Pallas kernels
# ----------------------------------------------------------------------------

def _nar_fused_kernel(*refs, num_layers, T, B, K, lp, H, layer_residual):
    """Stacked (pitch|energy) FSMN encoder + 4-way BiLSTM + fused FC, one kernel.

    refs = [x2d, (w1,b1,w2,dw) * num_layers,
            wih, b_lstm, whh, m_g, m_h, fc_w, fc_b, out]
    x2d is time-major flattened: row = t*B + b.
    """
    f32 = jnp.float32
    TB = T * B
    x_ref = refs[0]
    layer_refs = refs[1:1 + 4 * num_layers]
    i0 = 1 + 4 * num_layers
    (wih_ref, blstm_ref, whh_ref, mg_ref, mh_ref, fcw_ref, fcb_ref) = refs[i0:i0 + 7]
    o_ref = refs[i0 + 7]

    h = x_ref[...]
    for l in range(num_layers):
        w1 = layer_refs[4 * l][...].astype(f32)
        b1 = layer_refs[4 * l + 1][...]
        w2 = layer_refs[4 * l + 2][...].astype(f32)
        dw = layer_refs[4 * l + 3][...]
        hid = jnp.maximum(
            jnp.dot(h, w1, preferred_element_type=f32) + b1, 0.0)
        ctx = jnp.dot(hid, w2, preferred_element_type=f32)

        # MemoryBlockV2: depthwise conv over time (row shift = time shift * B)
        mem = ctx
        for k in range(K):
            d = (k - lp) * B
            sh = ctx if d == 0 else _shift_rows(ctx, d)
            mem = mem + sh * dw[k:k + 1, :]
        if layer_residual[l]:
            assert h.shape == mem.shape  # outer FSMN residual only when dims match
            mem = mem + h
        h = mem

    # hoisted LSTM input projection: one big matmul for all t and all 4 LSTMs
    xp = (jnp.dot(h, wih_ref[...].astype(f32), preferred_element_type=f32)
          + blstm_ref[...])                               # [TB, 16H]
    whh = whh_ref[...].astype(f32)
    mg = mg_ref[...]                                      # 1 -> forward gate cols
    mh = mh_ref[...]                                      # 1 -> forward hidden cols
    GA = 4 * H

    hs = jnp.zeros((B, 4 * H), f32)
    cs = jnp.zeros((B, 4 * H), f32)
    hist = []
    for t in range(T):                                    # small static T: unrolled
        xp_f = xp[t * B:(t + 1) * B, :]
        xp_r = xp[(T - 1 - t) * B:(T - t) * B, :]
        gates = (mg * xp_f + (1.0 - mg) * xp_r
                 + jnp.dot(hs, whh, preferred_element_type=f32))
        ig = jax.nn.sigmoid(gates[:, 0:GA])
        fg = jax.nn.sigmoid(gates[:, GA:2 * GA])
        gg = jnp.tanh(gates[:, 2 * GA:3 * GA])
        og = jax.nn.sigmoid(gates[:, 3 * GA:4 * GA])
        cs = fg * cs + ig * gg
        hs = og * jnp.tanh(cs)
        hist.append(hs)

    # realign backward-direction outputs, then ONE batched FC + ONE store
    rows = [mh * hist[t] + (1.0 - mh) * hist[T - 1 - t] for t in range(T)]
    h_all = jnp.concatenate(rows, axis=0)                 # [TB, 4H]
    o_ref[...] = (jnp.dot(h_all, fcw_ref[...], preferred_element_type=f32)
                  + fcb_ref[...])


def _dur_fused_kernel(x_ref, sig_ref, wp_ref, we_ref, bpe_ref,
                      pw1_ref, pb1_ref, pw2_ref, pb2_ref,
                      wih1p_ref, wih1c_ref, b1_ref, whh1_ref,
                      wih2_ref, b2_ref, whh2_ref, fcw_ref, fcb_ref,
                      o_ref, *, T, B, Hd, conv_pad, C):
    """Conv1d pitch/energy embeddings + duration prenet + cond projection +
    2-layer LSTM + FC, all fused (teacher forced).  Time-major rows t*B + b."""
    f32 = jnp.float32
    TB = T * B
    x = x_ref[...]                                        # [TB, Din]  ([text|spk|emo])
    din = x.shape[1]
    sig = sig_ref[...]                                    # [TB, 3]  (pitch|energy|dur)
    psig = sig[:, 0:1]
    esig = sig[:, 1:2]
    dsig = sig[:, 2:3]

    def conv_emb(s, w):                                   # s [TB,1], w [Kc, C]
        kc = w.shape[0]
        acc = jnp.zeros((TB, C), f32)
        for k in range(kc):
            acc = acc + _shift_rows(s, (k - conv_pad) * B) * w[k:k + 1, :]
        return acc

    emb = conv_emb(psig, wp_ref[...]) + conv_emb(esig, we_ref[...]) + bpe_ref[...]
    cond = x + jnp.concatenate(
        [emb, jnp.zeros((TB, din - C), f32)], axis=-1)    # text_aug | spk | emo

    # teacher-forced AR input: log(1 + dur[t-1]),  dur[-1] := 0 (go frame)
    dlog = jnp.log(_shift_rows(dsig, -B) + 1.0)           # [TB, 1]

    # prenet (2 x ReLU) + hoisted layer-1 LSTM input projection
    h = jnp.maximum(dlog * pw1_ref[...] + pb1_ref[...], 0.0)
    h = jnp.maximum(jnp.dot(h, pw2_ref[...].astype(f32),
                            preferred_element_type=f32) + pb2_ref[...], 0.0)
    xp1 = (jnp.dot(h, wih1p_ref[...].astype(f32), preferred_element_type=f32)
           + jnp.dot(cond, wih1c_ref[...].astype(f32), preferred_element_type=f32)
           + b1_ref[...])                                 # [TB, 4Hd]

    whh1 = whh1_ref[...].astype(f32)
    wih2 = wih2_ref[...].astype(f32)
    whh2 = whh2_ref[...].astype(f32)
    b2 = b2_ref[...]

    h1 = jnp.zeros((B, Hd), f32)
    c1 = jnp.zeros((B, Hd), f32)
    h2 = jnp.zeros((B, Hd), f32)
    c2 = jnp.zeros((B, Hd), f32)
    hist = []
    for t in range(T):
        g1 = xp1[t * B:(t + 1) * B, :] + jnp.dot(h1, whh1, preferred_element_type=f32)
        i1 = jax.nn.sigmoid(g1[:, 0:Hd])
        f1 = jax.nn.sigmoid(g1[:, Hd:2 * Hd])
        gg1 = jnp.tanh(g1[:, 2 * Hd:3 * Hd])
        o1 = jax.nn.sigmoid(g1[:, 3 * Hd:4 * Hd])
        c1 = f1 * c1 + i1 * gg1
        h1 = o1 * jnp.tanh(c1)

        g2 = (jnp.dot(h1, wih2, preferred_element_type=f32) + b2
              + jnp.dot(h2, whh2, preferred_element_type=f32))
        i2 = jax.nn.sigmoid(g2[:, 0:Hd])
        f2 = jax.nn.sigmoid(g2[:, Hd:2 * Hd])
        gg2 = jnp.tanh(g2[:, 2 * Hd:3 * Hd])
        o2 = jax.nn.sigmoid(g2[:, 3 * Hd:4 * Hd])
        c2 = f2 * c2 + i2 * gg2
        h2 = o2 * jnp.tanh(c2)
        hist.append(h2)

    h_all = jnp.concatenate(hist, axis=0)                 # [TB, Hd]
    o_ref[...] = (jnp.dot(h_all, fcw_ref[...], preferred_element_type=f32)
                  + fcb_ref[...])


def _expand_pe_kernel(text_ref, emo_ref, spk_ref, psig_ref, esig_ref,
                      wp_ref, we_ref, bpe_ref, start_ref, cum_ref, o_ref,
                      *, pe_depth, conv_pad):
    """Length regulator expand of [text_aug|emo|spk] (one To tile per step) with
    the expand matrix E, text_aug and the sinusoidal PE all built in-kernel."""
    f32 = jnp.float32
    B, Tin, C = text_ref.shape
    Ce = emo_ref.shape[2]
    Cs = spk_ref.shape[2]
    blk = o_ref.shape[1]
    Dout = o_ref.shape[2]

    # --- recompute text_aug = text + Conv1d(pitch) + Conv1d(energy) ---
    def conv_emb(sig3, w3):                               # sig3 [B,Tin,1], w3 [Kc,1,C]
        kc = w3.shape[0]
        acc = jnp.zeros((B, Tin, C), f32)
        for k in range(kc):
            acc = acc + _shift_time3(sig3, k - conv_pad) * w3[k:k + 1]
        return acc

    taug = (text_ref[...] + conv_emb(psig_ref[...], wp_ref[...])
            + conv_emb(esig_ref[...], we_ref[...]) + bpe_ref[...])
    x = jnp.concatenate(
        [taug, emo_ref[...], spk_ref[...],
         jnp.zeros((B, Tin, Dout - C - Ce - Cs), f32)], axis=-1)   # [B, Tin, Dout]

    # --- expand matrix E and gather, built from start/cum (no E in HBM) ---
    start = start_ref[...]                                # [B, 1, Tin]
    cum = cum_ref[...]
    base = pl.program_id(0) * blk
    fr = (lax.broadcasted_iota(jnp.int32, (B, blk, Tin), 1) + base).astype(f32)
    belongs = (fr >= start) & (fr < cum)
    E = belongs.astype(f32)
    out = jnp.einsum('boi,bid->bod', E, x, preferred_element_type=f32)

    # --- sinusoidal position encoding over the text channels ---
    tok_start = jnp.sum(jnp.where(belongs, start, 0.0), axis=-1, keepdims=True)
    valid = jnp.max(E, axis=-1, keepdims=True)            # [B, blk, 1]
    fro = (lax.broadcasted_iota(jnp.int32, (B, blk, 1), 1) + base).astype(f32)
    pos = (fro - tok_start + 1.0) * valid
    half = pe_depth // 2
    kk = lax.broadcasted_iota(jnp.int32, (B, blk, half), 2).astype(f32)
    inv = jnp.exp(kk * (-2.0 * np.log(10000.0) / pe_depth))
    ang = pos * inv
    pe = jnp.concatenate([jnp.sin(ang), jnp.cos(ang)], axis=-1) * valid
    pe_full = jnp.concatenate(
        [pe, jnp.zeros((B, blk, Dout - pe_depth), f32)], axis=-1)

    o_ref[...] = out + pe_full


# ----------------------------------------------------------------------------
# Wrappers
# ----------------------------------------------------------------------------

def nar_predictors_fused(x2d, P, *, T, B):
    """Stacked pitch+energy VarFsmnRnnNARPredictor.  x2d:[T*B, in_dim] time-major.
    Returns [T*B, 2] (col 0 pitch, col 1 energy)."""
    TB = T * B
    num_layers = len(P['layers'])
    inputs = [x2d]
    for ly in P['layers']:
        inputs += [ly['w1'], ly['b1'], ly['w2'], ly['dw']]
    inputs += [P['wih'], P['b_lstm'], P['whh'], P['m_g'], P['m_h'],
               P['fc_w'], P['fc_b']]
    kern = functools.partial(
        _nar_fused_kernel, num_layers=num_layers, T=T, B=B,
        K=P['K'], lp=P['lp'], H=P['H'],
        layer_residual=tuple(ly['residual'] for ly in P['layers']))
    return pl.pallas_call(
        kern, out_shape=jax.ShapeDtypeStruct((TB, 2), jnp.float32))(*inputs)


def dur_predictor_fused(x2d, sig2d, P, E, *, T, B, C):
    """VarRnnARPredictor (teacher forced) + Conv1d pitch/energy embeddings.
    x2d:[T*B, in_dim], sig2d:[T*B, 3]=(pitch|energy|dur), time-major rows."""
    TB = T * B
    kern = functools.partial(_dur_fused_kernel, T=T, B=B, Hd=P['H'],
                             conv_pad=E['pad'], C=C)
    return pl.pallas_call(
        kern, out_shape=jax.ShapeDtypeStruct((TB, 1), jnp.float32),
    )(x2d, sig2d, E['wp2'], E['we2'], E['bpe2'],
      P['pw1'], P['pb1'], P['pw2'], P['pb2'],
      P['wih1_pre'], P['wih1_cond'], P['b1'], P['whh1'],
      P['wih2'], P['b2'], P['whh2'], P['fc_w'], P['fc_b'])


def length_regulator_pe_fused(text, emo, spk, pitch_t, energy_t, durations,
                              E, C, Ce, Cs, r, max_out_len):
    """One expand of [text_aug|emo|spk] with in-kernel E / PE / text_aug.

    NOTE: max_out_len must be a static (Python int) upper bound on the per-batch
    sum(durations); it is computed on the host here."""
    B, Tin, _ = text.shape
    f32 = jnp.float32

    dur = durations.astype(f32)
    cum = jnp.cumsum(dur, axis=-1)                        # [B, Tin]
    start = cum - dur
    total_i = jnp.sum(durations.astype(jnp.int32), axis=-1)
    length_rounded = ((total_i + r - 1) // r) * r         # [B] int32

    To = max(int(max_out_len), r)
    To = -(-To // r) * r
    if To >= 256:
        blk = 256
    elif To >= 128:
        blk = 128
    else:
        blk = -(-To // 8) * 8
    To = -(-To // blk) * blk
    D = C + Ce + Cs
    Dp = -(-D // 128) * 128                               # lane-dense output width

    kern = functools.partial(_expand_pe_kernel, pe_depth=C, conv_pad=E['pad'])
    out = pl.pallas_call(
        kern,
        out_shape=jax.ShapeDtypeStruct((B, To, Dp), f32),
        grid=(To // blk,),
        in_specs=[
            pl.BlockSpec((B, Tin, C), lambda i: (0, 0, 0)),
            pl.BlockSpec((B, Tin, Ce), lambda i: (0, 0, 0)),
            pl.BlockSpec((B, Tin, Cs), lambda i: (0, 0, 0)),
            pl.BlockSpec((B, Tin, 1), lambda i: (0, 0, 0)),
            pl.BlockSpec((B, Tin, 1), lambda i: (0, 0, 0)),
            pl.BlockSpec(tuple(E['wp3'].shape), lambda i: (0, 0, 0)),
            pl.BlockSpec(tuple(E['we3'].shape), lambda i: (0, 0, 0)),
            pl.BlockSpec((1, 1, C), lambda i: (0, 0, 0)),
            pl.BlockSpec((B, 1, Tin), lambda i: (0, 0, 0)),
            pl.BlockSpec((B, 1, Tin), lambda i: (0, 0, 0)),
        ],
        out_specs=pl.BlockSpec((B, blk, Dp), lambda i: (0, i, 0)),
        compiler_params=pltpu.CompilerParams(dimension_semantics=("parallel",)),
    )(text.astype(f32), emo.astype(f32), spk.astype(f32),
      pitch_t.astype(f32)[:, :, None], energy_t.astype(f32)[:, :, None],
      E['wp3'], E['we3'], E['bpe3'],
      start[:, None, :], cum[:, None, :])

    return (out[:, :, :C], out[:, :, C:C + Ce], out[:, :, C + Ce:C + Ce + Cs],
            length_rounded)


# ----------------------------------------------------------------------------
# VarianceAdaptor forward (teacher-forced branch)
# ----------------------------------------------------------------------------

def variance_adaptor_forward(packed, cfg, text, emo, spk,
                             duration_targets, pitch_targets, energy_targets,
                             max_out_len):
    B, T, C = text.shape
    r = cfg['outputs_per_step']
    Ce = cfg['emotion_units']
    Cs = cfg['speaker_units']
    TB = T * B
    f32 = jnp.float32

    # shared time-major input [text | spk | emo] (one fused host prep op)
    x2d = jnp.transpose(jnp.concatenate([text, spk, emo], axis=-1),
                        (1, 0, 2)).reshape(TB, C + Cs + Ce).astype(f32)

    # 1) stacked pitch + energy NAR predictors (one kernel)
    nar2d = nar_predictors_fused(x2d, packed['nar'], T=T, B=B)
    pred = jnp.transpose(nar2d.reshape(T, B, 2), (1, 0, 2))
    pitch_pred, energy_pred = pred[..., 0], pred[..., 1]

    # 2) conv1d embeddings + duration predictor (one kernel)
    sig2d = jnp.transpose(
        jnp.stack([pitch_targets.astype(f32), energy_targets.astype(f32),
                   duration_targets.astype(f32)], axis=-1),
        (1, 0, 2)).reshape(TB, 3)
    dur2d = dur_predictor_fused(x2d, sig2d, packed['dur'], packed['emb'],
                                T=T, B=B, C=C)
    log_dur_pred = jnp.transpose(dur2d.reshape(T, B), (1, 0))

    # 3) length regulator + position encoding (text_aug recomputed in-kernel)
    LR_text, LR_emo, LR_spk, LR_len = length_regulator_pe_fused(
        text, emo, spk, pitch_targets, energy_targets, duration_targets,
        packed['emb'], C, Ce, Cs, r, max_out_len)

    return (LR_text, LR_emo, LR_spk, LR_len, log_dur_pred,
            pitch_pred, energy_pred)


# ----------------------------------------------------------------------------
# Deterministic parameter init (per-module) + packing into fused weights
# ----------------------------------------------------------------------------

def _dense_init(key, shape, scale=None):
    fan_in = shape[0]
    scale = scale if scale is not None else (1.0 / np.sqrt(max(fan_in, 1)))
    return scale * jax.random.normal(key, shape, dtype=jnp.float32)


def _lstm_init(key, in_dim, hid):
    k1, k2 = jax.random.split(key)
    return dict(wih=_dense_init(k1, (in_dim, 4 * hid)),
                whh=_dense_init(k2, (hid, 4 * hid)),
                b=jnp.zeros((4 * hid,), jnp.float32))


def init_nar_predictor(key, in_dim, ffn_inner, mem_units, filt, lstm_units,
                       num_layers):
    keys = jax.random.split(key, 3 * num_layers + 3)
    layers = []
    d_in, ki = in_dim, 0
    for _ in range(num_layers):
        layers.append(dict(
            w1=_dense_init(keys[ki], (d_in, ffn_inner)),
            b1=jnp.zeros((ffn_inner,), jnp.float32),
            w2=_dense_init(keys[ki + 1], (ffn_inner, mem_units)),
            dw=_dense_init(keys[ki + 2], (filt, mem_units), scale=0.1),
        ))
        ki += 3
        d_in = mem_units
    return dict(layers=layers,
                lstm_fwd=_lstm_init(keys[ki], mem_units, lstm_units),
                lstm_bwd=_lstm_init(keys[ki + 1], mem_units, lstm_units),
                fc_w=_dense_init(keys[ki + 2], (2 * lstm_units, 1)),
                fc_b=jnp.zeros((1,), jnp.float32))


def init_dur_predictor(key, cond_units, prenet_units, lstm_units):
    ks = jax.random.split(key, len(prenet_units) + 3)
    pre, d_in = [], 1
    for i, u in enumerate(prenet_units):
        pre.append(dict(w=_dense_init(ks[i], (d_in, u)),
                        b=jnp.zeros((u,), jnp.float32)))
        d_in = u
    l0 = _lstm_init(ks[-3], prenet_units[-1] + cond_units, lstm_units)
    l1 = _lstm_init(ks[-2], lstm_units, lstm_units)
    return dict(prenet=pre, lstm=[l0, l1],
                fc_w=_dense_init(ks[-1], (lstm_units, 1)),
                fc_b=jnp.zeros((1,), jnp.float32))


def init_variance_adaptor(key, cfg):
    in_dim = (cfg['encoder_projection_units'] + cfg['emotion_units']
              + cfg['speaker_units'])
    k1, k2, k3, k4, k5 = jax.random.split(key, 5)
    return dict(
        pitch_predictor=init_nar_predictor(
            k1, in_dim, cfg['predictor_ffn_inner_dim'],
            cfg['predictor_num_memory_units'], cfg['predictor_filter_size'],
            cfg['predictor_lstm_units'], cfg['predictor_fsmn_num_layers']),
        energy_predictor=init_nar_predictor(
            k2, in_dim, cfg['predictor_ffn_inner_dim'],
            cfg['predictor_num_memory_units'], cfg['predictor_filter_size'],
            cfg['predictor_lstm_units'], cfg['predictor_fsmn_num_layers']),
        duration_predictor=init_dur_predictor(
            k3, in_dim, cfg['dur_pred_prenet_units'], cfg['dur_pred_lstm_units']),
        pitch_emb_w=_dense_init(k4, (9, cfg['encoder_projection_units']), scale=0.2),
        pitch_emb_b=jnp.zeros((cfg['encoder_projection_units'],), jnp.float32),
        energy_emb_w=_dense_init(k5, (9, cfg['encoder_projection_units']), scale=0.2),
        energy_emb_b=jnp.zeros((cfg['encoder_projection_units'],), jnp.float32),
    )


def _bf16(a):
    # weight-only storage cast: halves HBM->VMEM DMA, converted back to f32 in
    # the kernels so elementwise/gate math stays f32 (v5e-safe).
    return jnp.asarray(np.asarray(a), dtype=jnp.bfloat16)


def pack_variance_adaptor(params, cfg):
    """Build stacked / block-diagonal weights for the fused kernels (numpy)."""
    mem = cfg['predictor_num_memory_units']
    H = cfg['predictor_lstm_units']
    K = cfg['predictor_filter_size']
    shift = cfg['predictor_shift']
    lp = int(round((K - 1) / 2)) + shift
    pp, pe = params['pitch_predictor'], params['energy_predictor']

    # --- stacked FSMN layers (pitch | energy along channels) ---
    layers = []
    for l, (lyp, lye) in enumerate(zip(pp['layers'], pe['layers'])):
        w1p, w1e = np.asarray(lyp['w1']), np.asarray(lye['w1'])
        d_in, ffn = w1p.shape
        if l == 0:                                  # shared input -> concat on N
            w1 = np.concatenate([w1p, w1e], axis=1)
        else:                                       # split input -> block diag
            w1 = np.zeros((2 * d_in, 2 * ffn), np.float32)
            w1[:d_in, :ffn] = w1p
            w1[d_in:, ffn:] = w1e
        b1 = np.concatenate([np.asarray(lyp['b1']),
                             np.asarray(lye['b1'])]).reshape(1, 2 * ffn)
        w2p, w2e = np.asarray(lyp['w2']), np.asarray(lye['w2'])
        w2 = np.zeros((2 * ffn, 2 * mem), np.float32)
        w2[:ffn, :mem] = w2p
        w2[ffn:, mem:] = w2e
        dw = np.concatenate([np.asarray(lyp['dw']), np.asarray(lye['dw'])], axis=1)
        layers.append(dict(w1=_bf16(w1), b1=jnp.asarray(b1),
                           w2=_bf16(w2), dw=jnp.asarray(dw),
                           residual=(d_in == mem)))

    # --- 4-way stacked BiLSTM, gate-major layout [i|f|g|o], sub-order pf,ef,pb,eb
    lstms = [pp['lstm_fwd'], pe['lstm_fwd'], pp['lstm_bwd'], pe['lstm_bwd']]
    rows = [(0, mem), (mem, 2 * mem), (0, mem), (mem, 2 * mem)]
    GA = 4 * H
    G = 4 * GA
    wih = np.zeros((2 * mem, G), np.float32)
    whh = np.zeros((4 * H, G), np.float32)
    b = np.zeros((G,), np.float32)
    for j, (lst, (r0, r1)) in enumerate(zip(lstms, rows)):
        wj = np.asarray(lst['wih'])
        uj = np.asarray(lst['whh'])
        bj = np.asarray(lst['b'])
        for g in range(4):
            c0 = g * GA + j * H
            c1 = c0 + H
            wih[r0:r1, c0:c1] = wj[:, g * H:(g + 1) * H]
            whh[j * H:(j + 1) * H, c0:c1] = uj[:, g * H:(g + 1) * H]
            b[c0:c1] = bj[g * H:(g + 1) * H]
    fc_w = np.zeros((4 * H, 2), np.float32)
    fcp, fce = np.asarray(pp['fc_w']), np.asarray(pe['fc_w'])
    fc_w[0:H, 0] = fcp[0:H, 0]
    fc_w[2 * H:3 * H, 0] = fcp[H:2 * H, 0]
    fc_w[H:2 * H, 1] = fce[0:H, 0]
    fc_w[3 * H:4 * H, 1] = fce[H:2 * H, 0]
    fc_b = np.array([float(np.asarray(pp['fc_b'])[0]),
                     float(np.asarray(pe['fc_b'])[0])], np.float32).reshape(1, 2)
    col = np.arange(G)
    m_g = ((col % GA) < 2 * H).astype(np.float32).reshape(1, G)
    m_h = (np.arange(4 * H) < 2 * H).astype(np.float32).reshape(1, 4 * H)

    nar = dict(layers=layers, wih=_bf16(wih),
               b_lstm=jnp.asarray(b.reshape(1, G)), whh=_bf16(whh),
               m_g=jnp.asarray(m_g), m_h=jnp.asarray(m_h),
               fc_w=jnp.asarray(fc_w), fc_b=jnp.asarray(fc_b),
               K=K, lp=lp, H=H)

    # --- duration predictor ---
    dp = params['duration_predictor']
    pw1 = np.asarray(dp['prenet'][0]['w'])          # [1, P0]
    pb1 = np.asarray(dp['prenet'][0]['b'])
    pw2 = np.asarray(dp['prenet'][1]['w'])
    pb2 = np.asarray(dp['prenet'][1]['b'])
    pre_out = pw2.shape[1]
    wih1 = np.asarray(dp['lstm'][0]['wih'])         # [pre_out + cond, 4*Hd]
    Hd = cfg['dur_pred_lstm_units']
    dur = dict(
        pw1=jnp.asarray(pw1.reshape(1, -1)),
        pb1=jnp.asarray(pb1.reshape(1, -1)),
        pw2=_bf16(pw2),
        pb2=jnp.asarray(pb2.reshape(1, -1)),
        wih1_pre=_bf16(wih1[:pre_out, :]),
        wih1_cond=_bf16(wih1[pre_out:, :]),
        b1=jnp.asarray(np.asarray(dp['lstm'][0]['b']).reshape(1, -1)),
        whh1=_bf16(np.asarray(dp['lstm'][0]['whh'])),
        wih2=_bf16(np.asarray(dp['lstm'][1]['wih'])),
        b2=jnp.asarray(np.asarray(dp['lstm'][1]['b']).reshape(1, -1)),
        whh2=_bf16(np.asarray(dp['lstm'][1]['whh'])),
        fc_w=jnp.asarray(np.asarray(dp['fc_w']).reshape(-1, 1)),
        fc_b=jnp.asarray(np.asarray(dp['fc_b']).reshape(1, 1)),
        H=Hd,
    )

    # --- Conv1d(1, C, k=9, pad=4) pitch / energy embeddings ---
    C = cfg['encoder_projection_units']
    wp = np.asarray(params['pitch_emb_w'])          # [9, C]
    we = np.asarray(params['energy_emb_w'])
    bp = np.asarray(params['pitch_emb_b'])
    be = np.asarray(params['energy_emb_b'])
    Kc = wp.shape[0]
    emb = dict(
        pad=(Kc - 1) // 2,
        wp2=jnp.asarray(wp), we2=jnp.asarray(we),
        bpe2=jnp.asarray((bp + be).reshape(1, C)),
        wp3=jnp.asarray(wp.reshape(Kc, 1, C)),
        we3=jnp.asarray(we.reshape(Kc, 1, C)),
        bpe3=jnp.asarray((bp + be).reshape(1, 1, C)),
    )
    return dict(nar=nar, dur=dur, emb=emb)


# ----------------------------------------------------------------------------
# Main
# ----------------------------------------------------------------------------

if __name__ == "__main__":
    cfg = dict(
        encoder_projection_units=32,
        emotion_units=8,
        speaker_units=8,
        predictor_filter_size=5,
        predictor_fsmn_num_layers=2,
        predictor_num_memory_units=32,
        predictor_ffn_inner_dim=64,
        predictor_dropout=0.0,          # dropout disabled (eval / deterministic)
        predictor_shift=0,
        predictor_lstm_units=16,
        dur_pred_prenet_units=[32, 32],
        dur_pred_lstm_units=32,
        outputs_per_step=2,
    )

    key = jax.random.PRNGKey(0)
    kp, kt, ke, ks, kd, kpi, ken = jax.random.split(key, 7)
    params = init_variance_adaptor(kp, cfg)
    packed = pack_variance_adaptor(params, cfg)

    B, T = 2, 8
    text = jax.random.normal(kt, (B, T, cfg['encoder_projection_units']), jnp.float32)
    emo = jax.random.normal(ke, (B, T, cfg['emotion_units']), jnp.float32)
    spk = jax.random.normal(ks, (B, T, cfg['speaker_units']), jnp.float32)
    duration_targets = jax.random.randint(kd, (B, T), 1, 5).astype(jnp.int32)
    pitch_targets = jax.random.normal(kpi, (B, T), jnp.float32)
    energy_targets = jax.random.normal(ken, (B, T), jnp.float32)

    r = cfg['outputs_per_step']
    totals = np.asarray(jnp.sum(duration_targets, axis=-1))
    max_out_len = int(np.ceil(totals.max() / r) * r)   # static upper bound

    outs = variance_adaptor_forward(packed, cfg, text, emo, spk,
                                    duration_targets, pitch_targets,
                                    energy_targets, max_out_len)
    for o in outs:
        jax.block_until_ready(o)
    print("KERNEL_OK")
</pallas_src>

<mosaic_0001>
module attributes {stable_mosaic.version = 11 : i64} {
  func.func @_nar_fused_kernel(%arg0: memref<16x48xf32, #tpu.memory_space<vmem>>, %arg1: memref<48x128xbf16, #tpu.memory_space<vmem>>, %arg2: memref<1x128xf32, #tpu.memory_space<vmem>>, %arg3: memref<128x64xbf16, #tpu.memory_space<vmem>>, %arg4: memref<5x64xf32, #tpu.memory_space<vmem>>, %arg5: memref<64x128xbf16, #tpu.memory_space<vmem>>, %arg6: memref<1x128xf32, #tpu.memory_space<vmem>>, %arg7: memref<128x64xbf16, #tpu.memory_space<vmem>>, %arg8: memref<5x64xf32, #tpu.memory_space<vmem>>, %arg9: memref<64x256xbf16, #tpu.memory_space<vmem>>, %arg10: memref<1x256xf32, #tpu.memory_space<vmem>>, %arg11: memref<64x256xbf16, #tpu.memory_space<vmem>>, %arg12: memref<1x256xf32, #tpu.memory_space<vmem>>, %arg13: memref<1x64xf32, #tpu.memory_space<vmem>>, %arg14: memref<64x2xf32, #tpu.memory_space<vmem>>, %arg15: memref<1x2xf32, #tpu.memory_space<vmem>>, %arg16: memref<16x2xf32, #tpu.memory_space<vmem>>) attributes {dimension_semantics = [], scalar_prefetch = 0 : i64, scratch_operands = 0 : i64, tpu.core_type = #tpu.core_type<tc>} {
    %c0 = arith.constant 0 : index
    %c0_0 = arith.constant 0 : index
    %0 = vector.load %arg0[%c0, %c0_0] : memref<16x48xf32, #tpu.memory_space<vmem>>, vector<16x48xf32>
    %c0_1 = arith.constant 0 : index
    %c0_2 = arith.constant 0 : index
    %1 = vector.load %arg1[%c0_1, %c0_2] : memref<48x128xbf16, #tpu.memory_space<vmem>>, vector<48x128xbf16>
    %2 = arith.extf %1 : vector<48x128xbf16> to vector<48x128xf32>
    %c0_3 = arith.constant 0 : index
    %c0_4 = arith.constant 0 : index
    %3 = vector.load %arg2[%c0_3, %c0_4] : memref<1x128xf32, #tpu.memory_space<vmem>>, vector<1x128xf32>
    %c0_5 = arith.constant 0 : index
    %c0_6 = arith.constant 0 : index
    %4 = vector.load %arg3[%c0_5, %c0_6] : memref<128x64xbf16, #tpu.memory_space<vmem>>, vector<128x64xbf16>
    %5 = arith.extf %4 : vector<128x64xbf16> to vector<128x64xf32>
    %c0_7 = arith.constant 0 : index
    %c0_8 = arith.constant 0 : index
    %6 = vector.load %arg4[%c0_7, %c0_8] : memref<5x64xf32, #tpu.memory_space<vmem>>, vector<5x64xf32>
    %cst = arith.constant dense<0.000000e+00> : vector<16x128xf32>
    %7 = tpu.matmul %0, %2, %cst {dimension_numbers = #tpu.dot_dimension_numbers<[1], [0], [0], [1], [0, 0, 1, 1], [], []>} : vector<16x48xf32>, vector<48x128xf32>, vector<16x128xf32> -> vector<16x128xf32>
    %8 = vector.broadcast %3 : vector<1x128xf32> to vector<16x128xf32>
    %9 = arith.addf %7, %8 : vector<16x128xf32>
    %cst_9 = arith.constant 0.000000e+00 : f32
    %10 = vector.broadcast %cst_9 : f32 to vector<16x128xf32>
    %11 = arith.maximumf %9, %10 : vector<16x128xf32>
    %cst_10 = arith.constant dense<0.000000e+00> : vector<16x64xf32>
    %12 = tpu.matmul %11, %5, %cst_10 {dimension_numbers = #tpu.dot_dimension_numbers<[1], [0], [0], [1], [0, 0, 1, 1], [], []>} : vector<16x128xf32>, vector<128x64xf32>, vector<16x64xf32> -> vector<16x64xf32>
    %cst_11 = arith.constant 0.000000e+00 : f32
    %13 = vector.broadcast %cst_11 : f32 to vector<4x64xf32>
    %14 = vector.extract_strided_slice %12 {offsets = [0, 0], sizes = [12, 64], strides = [1, 1]} : vector<16x64xf32> to vector<12x64xf32>
    %15 = tpu.concatenate %13, %14 in 0 : vector<4x64xf32>, vector<12x64xf32> -> vector<16x64xf32>
    %16 = vector.extract_strided_slice %6 {offsets = [0, 0], sizes = [1, 64], strides = [1, 1]} : vector<5x64xf32> to vector<1x64xf32>
    %17 = vector.broadcast %16 : vector<1x64xf32> to vector<16x64xf32>
    %18 = arith.mulf %15, %17 : vector<16x64xf32>
    %19 = arith.addf %12, %18 : vector<16x64xf32>
    %cst_12 = arith.constant 0.000000e+00 : f32
    %20 = vector.broadcast %cst_12 : f32 to vector<2x64xf32>
    %21 = vector.extract_strided_slice %12 {offsets = [0, 0], sizes = [14, 64], strides = [1, 1]} : vector<16x64xf32> to vector<14x64xf32>
    %22 = tpu.concatenate %20, %21 in 0 : vector<2x64xf32>, vector<14x64xf32> -> vector<16x64xf32>
    %23 = vector.extract_strided_slice %6 {offsets = [1, 0], sizes = [1, 64], strides = [1, 1]} : vector<5x64xf32> to vector<1x64xf32>
    %24 = vector.broadcast %23 : vector<1x64xf32> to vector<16x64xf32>
    %25 = arith.mulf %22, %24 : vector<16x64xf32>
    %26 = arith.addf %19, %25 : vector<16x64xf32>
    %27 = vector.extract_strided_slice %6 {offsets = [2, 0], sizes = [1, 64], strides = [1, 1]} : vector<5x64xf32> to vector<1x64xf32>
    %28 = vector.broadcast %27 : vector<1x64xf32> to vector<16x64xf32>
    %29 = arith.mulf %12, %28 : vector<16x64xf32>
    %30 = arith.addf %26, %29 : vector<16x64xf32>
    %cst_13 = arith.constant 0.000000e+00 : f32
    %31 = vector.broadcast %cst_13 : f32 to vector<2x64xf32>
    %32 = vector.extract_strided_slice %12 {offsets = [2, 0], sizes = [14, 64], strides = [1, 1]} : vector<16x64xf32> to vector<14x64xf32>
    %33 = tpu.concatenate %32, %31 in 0 : vector<14x64xf32>, vector<2x64xf32> -> vector<16x64xf32>
    %34 = vector.extract_strided_slice %6 {offsets = [3, 0], sizes = [1, 64], strides = [1, 1]} : vector<5x64xf32> to vector<1x64xf32>
    %35 = vector.broadcast %34 : vector<1x64xf32> to vector<16x64xf32>
    %36 = arith.mulf %33, %35 : vector<16x64xf32>
    %37 = arith.addf %30, %36 : vector<16x64xf32>
    %cst_14 = arith.constant 0.000000e+00 : f32
    %38 = vector.broadcast %cst_14 : f32 to vector<4x64xf32>
    %39 = vector.extract_strided_slice %12 {offsets = [4, 0], sizes = [12, 64], strides = [1, 1]} : vector<16x64xf32> to vector<12x64xf32>
    %40 = tpu.concatenate %39, %38 in 0 : vector<12x64xf32>, vector<4x64xf32> -> vector<16x64xf32>
    %41 = vector.extract_strided_slice %6 {offsets = [4, 0], sizes = [1, 64], strides = [1, 1]} : vector<5x64xf32> to vector<1x64xf32>
    %42 = vector.broadcast %41 : vector<1x64xf32> to vector<16x64xf32>
    %43 = arith.mulf %40, %42 : vector<16x64xf32>
    %44 = arith.addf %37, %43 : vector<16x64xf32>
    %c0_15 = arith.constant 0 : index
    %c0_16 = arith.constant 0 : index
    %45 = vector.load %arg5[%c0_15, %c0_16] : memref<64x128xbf16, #tpu.memory_space<vmem>>, vector<64x128xbf16>
    %46 = arith.extf %45 : vector<64x128xbf16> to vector<64x128xf32>
    %c0_17 = arith.constant 0 : index
    %c0_18 = arith.constant 0 : index
    %47 = vector.load %arg6[%c0_17, %c0_18] : memref<1x128xf32, #tpu.memory_space<vmem>>, vector<1x128xf32>
    %c0_19 = arith.constant 0 : index
    %c0_20 = arith.constant 0 : index
    %48 = vector.load %arg7[%c0_19, %c0_20] : memref<128x64xbf16, #tpu.memory_space<vmem>>, vector<128x64xbf16>
    %49 = arith.extf %48 : vector<128x64xbf16> to vector<128x64xf32>
    %c0_21 = arith.constant 0 : index
    %c0_22 = arith.constant 0 : index
    %50 = vector.load %arg8[%c0_21, %c0_22] : memref<5x64xf32, #tpu.memory_space<vmem>>, vector<5x64xf32>
    %cst_23 = arith.constant dense<0.000000e+00> : vector<16x128xf32>
    %51 = tpu.matmul %44, %46, %cst_23 {dimension_numbers = #tpu.dot_dimension_numbers<[1], [0], [0], [1], [0, 0, 1, 1], [], []>} : vector<16x64xf32>, vector<64x128xf32>, vector<16x128xf32> -> vector<16x128xf32>
    %52 = vector.broadcast %47 : vector<1x128xf32> to vector<16x128xf32>
    %53 = arith.addf %51, %52 : vector<16x128xf32>
    %cst_24 = arith.constant 0.000000e+00 : f32
    %54 = vector.broadcast %cst_24 : f32 to vector<16x128xf32>
    %55 = arith.maximumf %53, %54 : vector<16x128xf32>
    %cst_25 = arith.constant dense<0.000000e+00> : vector<16x64xf32>
    %56 = tpu.matmul %55, %49, %cst_25 {dimension_numbers = #tpu.dot_dimension_numbers<[1], [0], [0], [1], [0, 0, 1, 1], [], []>} : vector<16x128xf32>, vector<128x64xf32>, vector<16x64xf32> -> vector<16x64xf32>
    %cst_26 = arith.constant 0.000000e+00 : f32
    %57 = vector.broadcast %cst_26 : f32 to vector<4x64xf32>
    %58 = vector.extract_strided_slice %56 {offsets = [0, 0], sizes = [12, 64], strides = [1, 1]} : vector<16x64xf32> to vector<12x64xf32>
    %59 = tpu.concatenate %57, %58 in 0 : vector<4x64xf32>, vector<12x64xf32> -> vector<16x64xf32>
    %60 = vector.extract_strided_slice %50 {offsets = [0, 0], sizes = [1, 64], strides = [1, 1]} : vector<5x64xf32> to vector<1x64xf32>
    %61 = vector.broadcast %60 : vector<1x64xf32> to vector<16x64xf32>
    %62 = arith.mulf %59, %61 : vector<16x64xf32>
    %63 = arith.addf %56, %62 : vector<16x64xf32>
    %cst_27 = arith.constant 0.000000e+00 : f32
    %64 = vector.broadcast %cst_27 : f32 to vector<2x64xf32>
    %65 = vector.extract_strided_slice %56 {offsets = [0, 0], sizes = [14, 64], strides = [1, 1]} : vector<16x64xf32> to vector<14x64xf32>
    %66 = tpu.concatenate %64, %65 in 0 : vector<2x64xf32>, vector<14x64xf32> -> vector<16x64xf32>
    %67 = vector.extract_strided_slice %50 {offsets = [1, 0], sizes = [1, 64], strides = [1, 1]} : vector<5x64xf32> to vector<1x64xf32>
    %68 = vector.broadcast %67 : vector<1x64xf32> to vector<16x64xf32>
    %69 = arith.mulf %66, %68 : vector<16x64xf32>
    %70 = arith.addf %63, %69 : vector<16x64xf32>
    %71 = vector.extract_strided_slice %50 {offsets = [2, 0], sizes = [1, 64], strides = [1, 1]} : vector<5x64xf32> to vector<1x64xf32>
    %72 = vector.broadcast %71 : vector<1x64xf32> to vector<16x64xf32>
    %73 = arith.mulf %56, %72 : vector<16x64xf32>
    %74 = arith.addf %70, %73 : vector<16x64xf32>
    %cst_28 = arith.constant 0.000000e+00 : f32
    %75 = vector.broadcast %cst_28 : f32 to vector<2x64xf32>
    %76 = vector.extract_strided_slice %56 {offsets = [2, 0], sizes = [14, 64], strides = [1, 1]} : vector<16x64xf32> to vector<14x64xf32>
    %77 = tpu.concatenate %76, %75 in 0 : vector<14x64xf32>, vector<2x64xf32> -> vector<16x64xf32>
    %78 = vector.extract_strided_slice %50 {offsets = [3, 0], sizes = [1, 64], strides = [1, 1]} : vector<5x64xf32> to vector<1x64xf32>
    %79 = vector.broadcast %78 : vector<1x64xf32> to vector<16x64xf32>
    %80 = arith.mulf %77, %79 : vector<16x64xf32>
    %81 = arith.addf %74, %80 : vector<16x64xf32>
    %cst_29 = arith.constant 0.000000e+00 : f32
    %82 = vector.broadcast %cst_29 : f32 to vector<4x64xf32>
    %83 = vector.extract_strided_slice %56 {offsets = [4, 0], sizes = [12, 64], strides = [1, 1]} : vector<16x64xf32> to vector<12x64xf32>
    %84 = tpu.concatenate %83, %82 in 0 : vector<12x64xf32>, vector<4x64xf32> -> vector<16x64xf32>
    %85 = vector.extract_strided_slice %50 {offsets = [4, 0], sizes = [1, 64], strides = [1, 1]} : vector<5x64xf32> to vector<1x64xf32>
    %86 = vector.broadcast %85 : vector<1x64xf32> to vector<16x64xf32>
    %87 = arith.mulf %84, %86 : vector<16x64xf32>
    %88 = arith.addf %81, %87 : vector<16x64xf32>
    %89 = arith.addf %88, %44 : vector<16x64xf32>
    %c0_30 = arith.constant 0 : index
    %c0_31 = arith.constant 0 : index
    %90 = vector.load %arg9[%c0_30, %c0_31] : memref<64x256xbf16, #tpu.memory_space<vmem>>, vector<64x256xbf16>
    %91 = arith.extf %90 : vector<64x256xbf16> to vector<64x256xf32>
    %cst_32 = arith.constant dense<0.000000e+00> : vector<16x256xf32>
    %92 = tpu.matmul %89, %91, %cst_32 {dimension_numbers = #tpu.dot_dimension_numbers<[1], [0], [0], [1], [0, 0, 1, 1], [], []>} : vector<16x64xf32>, vector<64x256xf32>, vector<16x256xf32> -> vector<16x256xf32>
    %c0_33 = arith.constant 0 : index
    %c0_34 = arith.constant 0 : index
    %93 = vector.load %arg10[%c0_33, %c0_34] : memref<1x256xf32, #tpu.memory_space<vmem>>, vector<1x256xf32>
    %94 = vector.broadcast %93 : vector<1x256xf32> to vector<16x256xf32>
    %95 = arith.addf %92, %94 : vector<16x256xf32>
    %c0_35 = arith.constant 0 : index
    %c0_36 = arith.constant 0 : index
    %96 = vector.load %arg11[%c0_35, %c0_36] : memref<64x256xbf16, #tpu.memory_space<vmem>>, vector<64x256xbf16>
    %97 = arith.extf %96 : vector<64x256xbf16> to vector<64x256xf32>
    %c0_37 = arith.constant 0 : index
    %c0_38 = arith.constant 0 : index
    %98 = vector.load %arg12[%c0_37, %c0_38] : memref<1x256xf32, #tpu.memory_space<vmem>>, vector<1x256xf32>
    %c0_39 = arith.constant 0 : index
    %c0_40 = arith.constant 0 : index
    %99 = vector.load %arg13[%c0_39, %c0_40] : memref<1x64xf32, #tpu.memory_space<vmem>>, vector<1x64xf32>
    %cst_41 = arith.constant 0.000000e+00 : f32
    %100 = vector.broadcast %cst_41 : f32 to vector<2x64xf32>
    %cst_42 = arith.constant 0.000000e+00 : f32
    %101 = vector.broadcast %cst_42 : f32 to vector<2x64xf32>
    %102 = vector.extract_strided_slice %95 {offsets = [0, 0], sizes = [2, 256], strides = [1, 1]} : vector<16x256xf32> to vector<2x256xf32>
    %103 = vector.extract_strided_slice %95 {offsets = [14, 0], sizes = [2, 256], strides = [1, 1]} : vector<16x256xf32> to vector<2x256xf32>
    %104 = vector.broadcast %98 : vector<1x256xf32> to vector<2x256xf32>
    %105 = arith.mulf %104, %102 : vector<2x256xf32>
    %cst_43 = arith.constant 1.000000e+00 : f32
    %106 = vector.broadcast %cst_43 : f32 to vector<1x256xf32>
    %107 = arith.subf %106, %98 : vector<1x256xf32>
    %108 = vector.broadcast %107 : vector<1x256xf32> to vector<2x256xf32>
    %109 = arith.mulf %108, %103 : vector<2x256xf32>
    %110 = arith.addf %105, %109 : vector<2x256xf32>
    %cst_44 = arith.constant dense<0.000000e+00> : vector<2x256xf32>
    %111 = tpu.matmul %100, %97, %cst_44 {dimension_numbers = #tpu.dot_dimension_numbers<[1], [0], [0], [1], [0, 0, 1, 1], [], []>} : vector<2x64xf32>, vector<64x256xf32>, vector<2x256xf32> -> vector<2x256xf32>
    %112 = arith.addf %110, %111 : vector<2x256xf32>
    %113 = vector.extract_strided_slice %112 {offsets = [0, 0], sizes = [2, 64], strides = [1, 1]} : vector<2x256xf32> to vector<2x64xf32>
    %114 = arith.negf %113 : vector<2x64xf32>
    %115 = math.exp %114 : vector<2x64xf32>
    %cst_45 = arith.constant 1.000000e+00 : f32
    %116 = vector.broadcast %cst_45 : f32 to vector<2x64xf32>
    %117 = arith.addf %116, %115 : vector<2x64xf32>
    %118 = arith.divf %116, %117 : vector<2x64xf32>
    %119 = vector.extract_strided_slice %112 {offsets = [0, 64], sizes = [2, 64], strides = [1, 1]} : vector<2x256xf32> to vector<2x64xf32>
    %120 = arith.negf %119 : vector<2x64xf32>
    %121 = math.exp %120 : vector<2x64xf32>
    %cst_46 = arith.constant 1.000000e+00 : f32
    %122 = vector.broadcast %cst_46 : f32 to vector<2x64xf32>
    %123 = arith.addf %122, %121 : vector<2x64xf32>
    %124 = arith.divf %122, %123 : vector<2x64xf32>
    %125 = vector.extract_strided_slice %112 {offsets = [0, 128], sizes = [2, 64], strides = [1, 1]} : vector<2x256xf32> to vector<2x64xf32>
    %126 = math.tanh %125 : vector<2x64xf32>
    %127 = vector.extract_strided_slice %112 {offsets = [0, 192], sizes = [2, 64], strides = [1, 1]} : vector<2x256xf32> to vector<2x64xf32>
    %128 = arith.negf %127 : vector<2x64xf32>
    %129 = math.exp %128 : vector<2x64xf32>
    %cst_47 = arith.constant 1.000000e+00 : f32
    %130 = vector.broadcast %cst_47 : f32 to vector<2x64xf32>
    %131 = arith.addf %130, %129 : vector<2x64xf32>
    %132 = arith.divf %130, %131 : vector<2x64xf32>
    %133 = arith.mulf %124, %101 : vector<2x64xf32>
    %134 = arith.mulf %118, %126 : vector<2x64xf32>
    %135 = arith.addf %133, %134 : vector<2x64xf32>
    %136 = math.tanh %135 : vector<2x64xf32>
    %137 = arith.mulf %132, %136 : vector<2x64xf32>
    %138 = vector.extract_strided_slice %95 {offsets = [2, 0], sizes = [2, 256], strides = [1, 1]} : vector<16x256xf32> to vector<2x256xf32>
    %139 = vector.extract_strided_slice %95 {offsets = [12, 0], sizes = [2, 256], strides = [1, 1]} : vector<16x256xf32> to vector<2x256xf32>
    %140 = vector.broadcast %98 : vector<1x256xf32> to vector<2x256xf32>
    %141 = arith.mulf %140, %138 : vector<2x256xf32>
    %cst_48 = arith.constant 1.000000e+00 : f32
    %142 = vector.broadcast %cst_48 : f32 to vector<1x256xf32>
    %143 = arith.subf %142, %98 : vector<1x256xf32>
    %144 = vector.broadcast %143 : vector<1x256xf32> to vector<2x256xf32>
    %145 = arith.mulf %144, %139 : vector<2x256xf32>
    %146 = arith.addf %141, %145 : vector<2x256xf32>
    %cst_49 = arith.constant dense<0.000000e+00> : vector<2x256xf32>
    %147 = tpu.matmul %137, %97, %cst_49 {dimension_numbers = #tpu.dot_dimension_numbers<[1], [0], [0], [1], [0, 0, 1, 1], [], []>} : vector<2x64xf32>, vector<64x256xf32>, vector<2x256xf32> -> vector<2x256xf32>
    %148 = arith.addf %146, %147 : vector<2x256xf32>
    %149 = vector.extract_strided_slice %148 {offsets = [0, 0], sizes = [2, 64], strides = [1, 1]} : vector<2x256xf32> to vector<2x64xf32>
    %150 = arith.negf %149 : vector<2x64xf32>
    %151 = math.exp %150 : vector<2x64xf32>
    %cst_50 = arith.constant 1.000000e+00 : f32
    %152 = vector.broadcast %cst_50 : f32 to vector<2x64xf32>
    %153 = arith.addf %152, %151 : vector<2x64xf32>
    %154 = arith.divf %152, %153 : vector<2x64xf32>
    %155 = vector.extract_strided_slice %148 {offsets = [0, 64], sizes = [2, 64], strides = [1, 1]} : vector<2x256xf32> to vector<2x64xf32>
    %156 = arith.negf %155 : vector<2x64xf32>
    %157 = math.exp %156 : vector<2x64xf32>
    %cst_51 = arith.constant 1.000000e+00 : f32
    %158 = vector.broadcast %cst_51 : f32 to vector<2x64xf32>
    %159 = arith.addf %158, %157 : vector<2x64xf32>
    %160 = arith.divf %158, %159 : vector<2x64xf32>
    %161 = vector.extract_strided_slice %148 {offsets = [0, 128], sizes = [2, 64], strides = [1, 1]} : vector<2x256xf32> to vector<2x64xf32>
    %162 = math.tanh %161 : vector<2x64xf32>
    %163 = vector.extract_strided_slice %148 {offsets = [0, 192], sizes = [2, 64], strides = [1, 1]} : vector<2x256xf32> to vector<2x64xf32>
    %164 = arith.negf %163 : vector<2x64xf32>
    %165 = math.exp %164 : vector<2x64xf32>
    %cst_52 = arith.constant 1.000000e+00 : f32
    %166 = vector.broadcast %cst_52 : f32 to vector<2x64xf32>
    %167 = arith.addf %166, %165 : vector<2x64xf32>
    %168 = arith.divf %166, %167 : vector<2x64xf32>
    %169 = arith.mulf %160, %135 : vector<2x64xf32>
    %170 = arith.mulf %154, %162 : vector<2x64xf32>
    %171 = arith.addf %169, %170 : vector<2x64xf32>
    %172 = math.tanh %171 : vector<2x64xf32>
    %173 = arith.mulf %168, %172 : vector<2x64xf32>
    %174 = vector.extract_strided_slice %95 {offsets = [4, 0], sizes = [2, 256], strides = [1, 1]} : vector<16x256xf32> to vector<2x256xf32>
    %175 = vector.extract_strided_slice %95 {offsets = [10, 0], sizes = [2, 256], strides = [1, 1]} : vector<16x256xf32> to vector<2x256xf32>
    %176 = vector.broadcast %98 : vector<1x256xf32> to vector<2x256xf32>
    %177 = arith.mulf %176, %174 : vector<2x256xf32>
    %cst_53 = arith.constant 1.000000e+00 : f32
    %178 = vector.broadcast %cst_53 : f32 to vector<1x256xf32>
    %179 = arith.subf %178, %98 : vector<1x256xf32>
    %180 = vector.broadcast %179 : vector<1x256xf32> to vector<2x256xf32>
    %181 = arith.mulf %180, %175 : vector<2x256xf32>
    %182 = arith.addf %177, %181 : vector<2x256xf32>
    %cst_54 = arith.constant dense<0.000000e+00> : vector<2x256xf32>
    %183 = tpu.matmul %173, %97, %cst_54 {dimension_numbers = #tpu.dot_dimension_numbers<[1], [0], [0], [1], [0, 0, 1, 1], [], []>} : vector<2x64xf32>, vector<64x256xf32>, vector<2x256xf32> -> vector<2x256xf32>
    %184 = arith.addf %182, %183 : vector<2x256xf32>
    %185 = vector.extract_strided_slice %184 {offsets = [0, 0], sizes = [2, 64], strides = [1, 1]} : vector<2x256xf32> to vector<2x64xf32>
    %186 = arith.negf %185 : vector<2x64xf32>
    %187 = math.exp %186 : vector<2x64xf32>
    %cst_55 = arith.constant 1.000000e+00 : f32
    %188 = vector.broadcast %cst_55 : f32 to vector<2x64xf32>
    %189 = arith.addf %188, %187 : vector<2x64xf32>
    %190 = arith.divf %188, %189 : vector<2x64xf32>
    %191 = vector.extract_strided_slice %184 {offsets = [0, 64], sizes = [2, 64], strides = [1, 1]} : vector<2x256xf32> to vector<2x64xf32>
    %192 = arith.negf %191 : vector<2x64xf32>
    %193 = math.exp %192 : vector<2x64xf32>
    %cst_56 = arith.constant 1.000000e+00 : f32
    %194 = vector.broadcast %cst_56 : f32 to vector<2x64xf32>
    %195 = arith.addf %194, %193 : vector<2x64xf32>
    %196 = arith.divf %194, %195 : vector<2x64xf32>
    %197 = vector.extract_strided_slice %184 {offsets = [0, 128], sizes = [2, 64], strides = [1, 1]} : vector<2x256xf32> to vector<2x64xf32>
    %198 = math.tanh %197 : vector<2x64xf32>
    %199 = vector.extract_strided_slice %184 {offsets = [0, 192], sizes = [2, 64], strides = [1, 1]} : vector<2x256xf32> to vector<2x64xf32>
    %200 = arith.negf %199 : vector<2x64xf32>
    %201 = math.exp %200 : vector<2x64xf32>
    %cst_57 = arith.constant 1.000000e+00 : f32
    %202 = vector.broadcast %cst_57 : f32 to vector<2x64xf32>
    %203 = arith.addf %202, %201 : vector<2x64xf32>
    %204 = arith.divf %202, %203 : vector<2x64xf32>
    %205 = arith.mulf %196, %171 : vector<2x64xf32>
    %206 = arith.mulf %190, %198 : vector<2x64xf32>
    %207 = arith.addf %205, %206 : vector<2x64xf32>
    %208 = math.tanh %207 : vector<2x64xf32>
    %209 = arith.mulf %204, %208 : vector<2x64xf32>
    %210 = vector.extract_strided_slice %95 {offsets = [6, 0], sizes = [2, 256], strides = [1, 1]} : vector<16x256xf32> to vector<2x256xf32>
    %211 = vector.extract_strided_slice %95 {offsets = [8, 0], sizes = [2, 256], strides = [1, 1]} : vector<16x256xf32> to vector<2x256xf32>
    %212 = vector.broadcast %98 : vector<1x256xf32> to vector<2x256xf32>
    %213 = arith.mulf %212, %210 : vector<2x256xf32>
    %cst_58 = arith.constant 1.000000e+00 : f32
    %214 = vector.broadcast %cst_58 : f32 to vector<1x256xf32>
    %215 = arith.subf %214, %98 : vector<1x256xf32>
    %216 = vector.broadcast %215 : vector<1x256xf32> to vector<2x256xf32>
    %217 = arith.mulf %216, %211 : vector<2x256xf32>
    %218 = arith.addf %213, %217 : vector<2x256xf32>
    %cst_59 = arith.constant dense<0.000000e+00> : vector<2x256xf32>
    %219 = tpu.matmul %209, %97, %cst_59 {dimension_numbers = #tpu.dot_dimension_numbers<[1], [0], [0], [1], [0, 0, 1, 1], [], []>} : vector<2x64xf32>, vector<64x256xf32>, vector<2x256xf32> -> vector<2x256xf32>
    %220 = arith.addf %218, %219 : vector<2x256xf32>
    %221 = vector.extract_strided_slice %220 {offsets = [0, 0], sizes = [2, 64], strides = [1, 1]} : vector<2x256xf32> to vector<2x64xf32>
    %222 = arith.negf %221 : vector<2x64xf32>
    %223 = math.exp %222 : vector<2x64xf32>
    %cst_60 = arith.constant 1.000000e+00 : f32
    %224 = vector.broadcast %cst_60 : f32 to vector<2x64xf32>
    %225 = arith.addf %224, %223 : vector<2x64xf32>
    %226 = arith.divf %224, %225 : vector<2x64xf32>
    %227 = vector.extract_strided_slice %220 {offsets = [0, 64], sizes = [2, 64], strides = [1, 1]} : vector<2x256xf32> to vector<2x64xf32>
    %228 = arith.negf %227 : vector<2x64xf32>
    %229 = math.exp %228 : vector<2x64xf32>
    %cst_61 = arith.constant 1.000000e+00 : f32
    %230 = vector.broadcast %cst_61 : f32 to vector<2x64xf32>
    %231 = arith.addf %230, %229 : vector<2x64xf32>
    %232 = arith.divf %230, %231 : vector<2x64xf32>
    %233 = vector.extract_strided_slice %220 {offsets = [0, 128], sizes = [2, 64], strides = [1, 1]} : vector<2x256xf32> to vector<2x64xf32>
    %234 = math.tanh %233 : vector<2x64xf32>
    %235 = vector.extract_strided_slice %220 {offsets = [0, 192], sizes = [2, 64], strides = [1, 1]} : vector<2x256xf32> to vector<2x64xf32>
    %236 = arith.negf %235 : vector<2x64xf32>
    %237 = math.exp %236 : vector<2x64xf32>
    %cst_62 = arith.constant 1.000000e+00 : f32
    %238 = vector.broadcast %cst_62 : f32 to vector<2x64xf32>
    %239 = arith.addf %238, %237 : vector<2x64xf32>
    %240 = arith.divf %238, %239 : vector<2x64xf32>
    %241 = arith.mulf %232, %207 : vector<2x64xf32>
    %242 = arith.mulf %226, %234 : vector<2x64xf32>
    %243 = arith.addf %241, %242 : vector<2x64xf32>
    %244 = math.tanh %243 : vector<2x64xf32>
    %245 = arith.mulf %240, %244 : vector<2x64xf32>
    %246 = vector.extract_strided_slice %95 {offsets = [8, 0], sizes = [2, 256], strides = [1, 1]} : vector<16x256xf32> to vector<2x256xf32>
    %247 = vector.extract_strided_slice %95 {offsets = [6, 0], sizes = [2, 256], strides = [1, 1]} : vector<16x256xf32> to vector<2x256xf32>
    %248 = vector.broadcast %98 : vector<1x256xf32> to vector<2x256xf32>
    %249 = arith.mulf %248, %246 : vector<2x256xf32>
    %cst_63 = arith.constant 1.000000e+00 : f32
    %250 = vector.broadcast %cst_63 : f32 to vector<1x256xf32>
    %251 = arith.subf %250, %98 : vector<1x256xf32>
    %252 = vector.broadcast %251 : vector<1x256xf32> to vector<2x256xf32>
    %253 = arith.mulf %252, %247 : vector<2x256xf32>
    %254 = arith.addf %249, %253 : vector<2x256xf32>
    %cst_64 = arith.constant dense<0.000000e+00> : vector<2x256xf32>
    %255 = tpu.matmul %245, %97, %cst_64 {dimension_numbers = #tpu.dot_dimension_numbers<[1], [0], [0], [1], [0, 0, 1, 1], [], []>} : vector<2x64xf32>, vector<64x256xf32>, vector<2x256xf32> -> vector<2x256xf32>
    %256 = arith.addf %254, %255 : vector<2x256xf32>
    %257 = vector.extract_strided_slice %256 {offsets = [0, 0], sizes = [2, 64], strides = [1, 1]} : vector<2x256xf32> to vector<2x64xf32>
    %258 = arith.negf %257 : vector<2x64xf32>
    %259 = math.exp %258 : vector<2x64xf32>
    %cst_65 = arith.constant 1.000000e+00 : f32
    %260 = vector.broadcast %cst_65 : f32 to vector<2x64xf32>
    %261 = arith.addf %260, %259 : vector<2x64xf32>
    %262 = arith.divf %260, %261 : vector<2x64xf32>
    %263 = vector.extract_strided_slice %256 {offsets = [0, 64], sizes = [2, 64], strides = [1, 1]} : vector<2x256xf32> to vector<2x64xf32>
    %264 = arith.negf %263 : vector<2x64xf32>
    %265 = math.exp %264 : vector<2x64xf32>
    %cst_66 = arith.constant 1.000000e+00 : f32
    %266 = vector.broadcast %cst_66 : f32 to vector<2x64xf32>
    %267 = arith.addf %266, %265 : vector<2x64xf32>
    %268 = arith.divf %266, %267 : vector<2x64xf32>
    %269 = vector.extract_strided_slice %256 {offsets = [0, 128], sizes = [2, 64], strides = [1, 1]} : vector<2x256xf32> to vector<2x64xf32>
    %270 = math.tanh %269 : vector<2x64xf32>
    %271 = vector.extract_strided_slice %256 {offsets = [0, 192], sizes = [2, 64], strides = [1, 1]} : vector<2x256xf32> to vector<2x64xf32>
    %272 = arith.negf %271 : vector<2x64xf32>
    %273 = math.exp %272 : vector<2x64xf32>
    %cst_67 = arith.constant 1.000000e+00 : f32
    %274 = vector.broadcast %cst_67 : f32 to vector<2x64xf32>
    %275 = arith.addf %274, %273 : vector<2x64xf32>
    %276 = arith.divf %274, %275 : vector<2x64xf32>
    %277 = arith.mulf %268, %243 : vector<2x64xf32>
    %278 = arith.mulf %262, %270 : vector<2x64xf32>
    %279 = arith.addf %277, %278 : vector<2x64xf32>
    %280 = math.tanh %279 : vector<2x64xf32>
    %281 = arith.mulf %276, %280 : vector<2x64xf32>
    %282 = vector.extract_strided_slice %95 {offsets = [10, 0], sizes = [2, 256], strides = [1, 1]} : vector<16x256xf32> to vector<2x256xf32>
    %283 = vector.extract_strided_slice %95 {offsets = [4, 0], sizes = [2, 256], strides = [1, 1]} : vector<16x256xf32> to vector<2x256xf32>
    %284 = vector.broadcast %98 : vector<1x256xf32> to vector<2x256xf32>
    %285 = arith.mulf %284, %282 : vector<2x256xf32>
    %cst_68 = arith.constant 1.000000e+00 : f32
    %286 = vector.broadcast %cst_68 : f32 to vector<1x256xf32>
    %287 = arith.subf %286, %98 : vector<1x256xf32>
    %288 = vector.broadcast %287 : vector<1x256xf32> to vector<2x256xf32>
    %289 = arith.mulf %288, %283 : vector<2x256xf32>
    %290 = arith.addf %285, %289 : vector<2x256xf32>
    %cst_69 = arith.constant dense<0.000000e+00> : vector<2x256xf32>
    %291 = tpu.matmul %281, %97, %cst_69 {dimension_numbers = #tpu.dot_dimension_numbers<[1], [0], [0], [1], [0, 0, 1, 1], [], []>} : vector<2x64xf32>, vector<64x256xf32>, vector<2x256xf32> -> vector<2x256xf32>
    %292 = arith.addf %290, %291 : vector<2x256xf32>
    %293 = vector.extract_strided_slice %292 {offsets = [0, 0], sizes = [2, 64], strides = [1, 1]} : vector<2x256xf32> to vector<2x64xf32>
    %294 = arith.negf %293 : vector<2x64xf32>
    %295 = math.exp %294 : vector<2x64xf32>
    %cst_70 = arith.constant 1.000000e+00 : f32
    %296 = vector.broadcast %cst_70 : f32 to vector<2x64xf32>
    %297 = arith.addf %296, %295 : vector<2x64xf32>
    %298 = arith.divf %296, %297 : vector<2x64xf32>
    %299 = vector.extract_strided_slice %292 {offsets = [0, 64], sizes = [2, 64], strides = [1, 1]} : vector<2x256xf32> to vector<2x64xf32>
    %300 = arith.negf %299 : vector<2x64xf32>
    %301 = math.exp %300 : vector<2x64xf32>
    %cst_71 = arith.constant 1.000000e+00 : f32
    %302 = vector.broadcast %cst_71 : f32 to vector<2x64xf32>
    %303 = arith.addf %302, %301 : vector<2x64xf32>
    %304 = arith.divf %302, %303 : vector<2x64xf32>
    %305 = vector.extract_strided_slice %292 {offsets = [0, 128], sizes = [2, 64], strides = [1, 1]} : vector<2x256xf32> to vector<2x64xf32>
    %306 = math.tanh %305 : vector<2x64xf32>
    %307 = vector.extract_strided_slice %292 {offsets = [0, 192], sizes = [2, 64], strides = [1, 1]} : vector<2x256xf32> to vector<2x64xf32>
    %308 = arith.negf %307 : vector<2x64xf32>
    %309 = math.exp %308 : vector<2x64xf32>
    %cst_72 = arith.constant 1.000000e+00 : f32
    %310 = vector.broadcast %cst_72 : f32 to vector<2x64xf32>
    %311 = arith.addf %310, %309 : vector<2x64xf32>
    %312 = arith.divf %310, %311 : vector<2x64xf32>
    %313 = arith.mulf %304, %279 : vector<2x64xf32>
    %314 = arith.mulf %298, %306 : vector<2x64xf32>
    %315 = arith.addf %313, %314 : vector<2x64xf32>
    %316 = math.tanh %315 : vector<2x64xf32>
    %317 = arith.mulf %312, %316 : vector<2x64xf32>
    %318 = vector.extract_strided_slice %95 {offsets = [12, 0], sizes = [2, 256], strides = [1, 1]} : vector<16x256xf32> to vector<2x256xf32>
    %319 = vector.extract_strided_slice %95 {offsets = [2, 0], sizes = [2, 256], strides = [1, 1]} : vector<16x256xf32> to vector<2x256xf32>
    %320 = vector.broadcast %98 : vector<1x256xf32> to vector<2x256xf32>
    %321 = arith.mulf %320, %318 : vector<2x256xf32>
    %cst_73 = arith.constant 1.000000e+00 : f32
    %322 = vector.broadcast %cst_73 : f32 to vector<1x256xf32>
    %323 = arith.subf %322, %98 : vector<1x256xf32>
    %324 = vector.broadcast %323 : vector<1x256xf32> to vector<2x256xf32>
    %325 = arith.mulf %324, %319 : vector<2x256xf32>
    %326 = arith.addf %321, %325 : vector<2x256xf32>
    %cst_74 = arith.constant dense<0.000000e+00> : vector<2x256xf32>
    %327 = tpu.matmul %317, %97, %cst_74 {dimension_numbers = #tpu.dot_dimension_numbers<[1], [0], [0], [1], [0, 0, 1, 1], [], []>} : vector<2x64xf32>, vector<64x256xf32>, vector<2x256xf32> -> vector<2x256xf32>
    %328 = arith.addf %326, %327 : vector<2x256xf32>
    %329 = vector.extract_strided_slice %328 {offsets = [0, 0], sizes = [2, 64], strides = [1, 1]} : vector<2x256xf32> to vector<2x64xf32>
    %330 = arith.negf %329 : vector<2x64xf32>
    %331 = math.exp %330 : vector<2x64xf32>
    %cst_75 = arith.constant 1.000000e+00 : f32
    %332 = vector.broadcast %cst_75 : f32 to vector<2x64xf32>
    %333 = arith.addf %332, %331 : vector<2x64xf32>
    %334 = arith.divf %332, %333 : vector<2x64xf32>
    %335 = vector.extract_strided_slice %328 {offsets = [0, 64], sizes = [2, 64], strides = [1, 1]} : vector<2x256xf32> to vector<2x64xf32>
    %336 = arith.negf %335 : vector<2x64xf32>
    %337 = math.exp %336 : vector<2x64xf32>
    %cst_76 = arith.constant 1.000000e+00 : f32
    %338 = vector.broadcast %cst_76 : f32 to vector<2x64xf32>
    %339 = arith.addf %338, %337 : vector<2x64xf32>
    %340 = arith.divf %338, %339 : vector<2x64xf32>
    %341 = vector.extract_strided_slice %328 {offsets = [0, 128], sizes = [2, 64], strides = [1, 1]} : vector<2x256xf32> to vector<2x64xf32>
    %342 = math.tanh %341 : vector<2x64xf32>
    %343 = vector.extract_strided_slice %328 {offsets = [0, 192], sizes = [2, 64], strides = [1, 1]} : vector<2x256xf32> to vector<2x64xf32>
    %344 = arith.negf %343 : vector<2x64xf32>
    %345 = math.exp %344 : vector<2x64xf32>
    %cst_77 = arith.constant 1.000000e+00 : f32
    %346 = vector.broadcast %cst_77 : f32 to vector<2x64xf32>
    %347 = arith.addf %346, %345 : vector<2x64xf32>
    %348 = arith.divf %346, %347 : vector<2x64xf32>
    %349 = arith.mulf %340, %315 : vector<2x64xf32>
    %350 = arith.mulf %334, %342 : vector<2x64xf32>
    %351 = arith.addf %349, %350 : vector<2x64xf32>
    %352 = math.tanh %351 : vector<2x64xf32>
    %353 = arith.mulf %348, %352 : vector<2x64xf32>
    %354 = vector.extract_strided_slice %95 {offsets = [14, 0], sizes = [2, 256], strides = [1, 1]} : vector<16x256xf32> to vector<2x256xf32>
    %355 = vector.extract_strided_slice %95 {offsets = [0, 0], sizes = [2, 256], strides = [1, 1]} : vector<16x256xf32> to vector<2x256xf32>
    %356 = vector.broadcast %98 : vector<1x256xf32> to vector<2x256xf32>
    %357 = arith.mulf %356, %354 : vector<2x256xf32>
    %cst_78 = arith.constant 1.000000e+00 : f32
    %358 = vector.broadcast %cst_78 : f32 to vector<1x256xf32>
    %359 = arith.subf %358, %98 : vector<1x256xf32>
    %360 = vector.broadcast %359 : vector<1x256xf32> to vector<2x256xf32>
    %361 = arith.mulf %360, %355 : vector<2x256xf32>
    %362 = arith.addf %357, %361 : vector<2x256xf32>
    %cst_79 = arith.constant dense<0.000000e+00> : vector<2x256xf32>
    %363 = tpu.matmul %353, %97, %cst_79 {dimension_numbers = #tpu.dot_dimension_numbers<[1], [0], [0], [1], [0, 0, 1, 1], [], []>} : vector<2x64xf32>, vector<64x256xf32>, vector<2x256xf32> -> vector<2x256xf32>
    %364 = arith.addf %362, %363 : vector<2x256xf32>
    %365 = vector.extract_strided_slice %364 {offsets = [0, 0], sizes = [2, 64], strides = [1, 1]} : vector<2x256xf32> to vector<2x64xf32>
    %366 = arith.negf %365 : vector<2x64xf32>
    %367 = math.exp %366 : vector<2x64xf32>
    %cst_80 = arith.constant 1.000000e+00 : f32
    %368 = vector.broadcast %cst_80 : f32 to vector<2x64xf32>
    %369 = arith.addf %368, %367 : vector<2x64xf32>
    %370 = arith.divf %368, %369 : vector<2x64xf32>
    %371 = vector.extract_strided_slice %364 {offsets = [0, 64], sizes = [2, 64], strides = [1, 1]} : vector<2x256xf32> to vector<2x64xf32>
    %372 = arith.negf %371 : vector<2x64xf32>
    %373 = math.exp %372 : vector<2x64xf32>
    %cst_81 = arith.constant 1.000000e+00 : f32
    %374 = vector.broadcast %cst_81 : f32 to vector<2x64xf32>
    %375 = arith.addf %374, %373 : vector<2x64xf32>
    %376 = arith.divf %374, %375 : vector<2x64xf32>
    %377 = vector.extract_strided_slice %364 {offsets = [0, 128], sizes = [2, 64], strides = [1, 1]} : vector<2x256xf32> to vector<2x64xf32>
    %378 = math.tanh %377 : vector<2x64xf32>
    %379 = vector.extract_strided_slice %364 {offsets = [0, 192], sizes = [2, 64], strides = [1, 1]} : vector<2x256xf32> to vector<2x64xf32>
    %380 = arith.negf %379 : vector<2x64xf32>
    %381 = math.exp %380 : vector<2x64xf32>
    %cst_82 = arith.constant 1.000000e+00 : f32
    %382 = vector.broadcast %cst_82 : f32 to vector<2x64xf32>
    %383 = arith.addf %382, %381 : vector<2x64xf32>
    %384 = arith.divf %382, %383 : vector<2x64xf32>
    %385 = arith.mulf %376, %351 : vector<2x64xf32>
    %386 = arith.mulf %370, %378 : vector<2x64xf32>
    %387 = arith.addf %385, %386 : vector<2x64xf32>
    %388 = math.tanh %387 : vector<2x64xf32>
    %389 = arith.mulf %384, %388 : vector<2x64xf32>
    %390 = vector.broadcast %99 : vector<1x64xf32> to vector<2x64xf32>
    %391 = arith.mulf %390, %137 : vector<2x64xf32>
    %cst_83 = arith.constant 1.000000e+00 : f32
    %392 = vector.broadcast %cst_83 : f32 to vector<1x64xf32>
    %393 = arith.subf %392, %99 : vector<1x64xf32>
    %394 = vector.broadcast %393 : vector<1x64xf32> to vector<2x64xf32>
    %395 = arith.mulf %394, %389 : vector<2x64xf32>
    %396 = arith.addf %391, %395 : vector<2x64xf32>
    %397 = vector.broadcast %99 : vector<1x64xf32> to vector<2x64xf32>
    %398 = arith.mulf %397, %173 : vector<2x64xf32>
    %cst_84 = arith.constant 1.000000e+00 : f32
    %399 = vector.broadcast %cst_84 : f32 to vector<1x64xf32>
    %400 = arith.subf %399, %99 : vector<1x64xf32>
    %401 = vector.broadcast %400 : vector<1x64xf32> to vector<2x64xf32>
    %402 = arith.mulf %401, %353 : vector<2x64xf32>
    %403 = arith.addf %398, %402 : vector<2x64xf32>
    %404 = vector.broadcast %99 : vector<1x64xf32> to vector<2x64xf32>
    %405 = arith.mulf %404, %209 : vector<2x64xf32>
    %cst_85 = arith.constant 1.000000e+00 : f32
    %406 = vector.broadcast %cst_85 : f32 to vector<1x64xf32>
    %407 = arith.subf %406, %99 : vector<1x64xf32>
    %408 = vector.broadcast %407 : vector<1x64xf32> to vector<2x64xf32>
    %409 = arith.mulf %408, %317 : vector<2x64xf32>
    %410 = arith.addf %405, %409 : vector<2x64xf32>
    %411 = vector.broadcast %99 : vector<1x64xf32> to vector<2x64xf32>
    %412 = arith.mulf %411, %245 : vector<2x64xf32>
    %cst_86 = arith.constant 1.000000e+00 : f32
    %413 = vector.broadcast %cst_86 : f32 to vector<1x64xf32>
    %414 = arith.subf %413, %99 : vector<1x64xf32>
    %415 = vector.broadcast %414 : vector<1x64xf32> to vector<2x64xf32>
    %416 = arith.mulf %415, %281 : vector<2x64xf32>
    %417 = arith.addf %412, %416 : vector<2x64xf32>
    %418 = vector.broadcast %99 : vector<1x64xf32> to vector<2x64xf32>
    %419 = arith.mulf %418, %281 : vector<2x64xf32>
    %cst_87 = arith.constant 1.000000e+00 : f32
    %420 = vector.broadcast %cst_87 : f32 to vector<1x64xf32>
    %421 = arith.subf %420, %99 : vector<1x64xf32>
    %422 = vector.broadcast %421 : vector<1x64xf32> to vector<2x64xf32>
    %423 = arith.mulf %422, %245 : vector<2x64xf32>
    %424 = arith.addf %419, %423 : vector<2x64xf32>
    %425 = vector.broadcast %99 : vector<1x64xf32> to vector<2x64xf32>
    %426 = arith.mulf %425, %317 : vector<2x64xf32>
    %cst_88 = arith.constant 1.000000e+00 : f32
    %427 = vector.broadcast %cst_88 : f32 to vector<1x64xf32>
    %428 = arith.subf %427, %99 : vector<1x64xf32>
    %429 = vector.broadcast %428 : vector<1x64xf32> to vector<2x64xf32>
    %430 = arith.mulf %429, %209 : vector<2x64xf32>
    %431 = arith.addf %426, %430 : vector<2x64xf32>
    %432 = vector.broadcast %99 : vector<1x64xf32> to vector<2x64xf32>
    %433 = arith.mulf %432, %353 : vector<2x64xf32>
    %cst_89 = arith.constant 1.000000e+00 : f32
    %434 = vector.broadcast %cst_89 : f32 to vector<1x64xf32>
    %435 = arith.subf %434, %99 : vector<1x64xf32>
    %436 = vector.broadcast %435 : vector<1x64xf32> to vector<2x64xf32>
    %437 = arith.mulf %436, %173 : vector<2x64xf32>
    %438 = arith.addf %433, %437 : vector<2x64xf32>
    %439 = vector.broadcast %99 : vector<1x64xf32> to vector<2x64xf32>
    %440 = arith.mulf %439, %389 : vector<2x64xf32>
    %cst_90 = arith.constant 1.000000e+00 : f32
    %441 = vector.broadcast %cst_90 : f32 to vector<1x64xf32>
    %442 = arith.subf %441, %99 : vector<1x64xf32>
    %443 = vector.broadcast %442 : vector<1x64xf32> to vector<2x64xf32>
    %444 = arith.mulf %443, %137 : vector<2x64xf32>
    %445 = arith.addf %440, %444 : vector<2x64xf32>
    %446 = tpu.concatenate %396, %403, %410, %417, %424, %431, %438, %445 in 0 : vector<2x64xf32>, vector<2x64xf32>, vector<2x64xf32>, vector<2x64xf32>, vector<2x64xf32>, vector<2x64xf32>, vector<2x64xf32>, vector<2x64xf32> -> vector<16x64xf32>
    %c0_91 = arith.constant 0 : index
    %c0_92 = arith.constant 0 : index
    %447 = vector.load %arg14[%c0_91, %c0_92] : memref<64x2xf32, #tpu.memory_space<vmem>>, vector<64x2xf32>
    %cst_93 = arith.constant dense<0.000000e+00> : vector<16x2xf32>
    %448 = tpu.matmul %446, %447, %cst_93 {dimension_numbers = #tpu.dot_dimension_numbers<[1], [0], [0], [1], [0, 0, 1, 1], [], []>} : vector<16x64xf32>, vector<64x2xf32>, vector<16x2xf32> -> vector<16x2xf32>
    %c0_94 = arith.constant 0 : index
    %c0_95 = arith.constant 0 : index
    %449 = vector.load %arg15[%c0_94, %c0_95] : memref<1x2xf32, #tpu.memory_space<vmem>>, vector<1x2xf32>
    %450 = vector.broadcast %449 : vector<1x2xf32> to vector<16x2xf32>
    %451 = arith.addf %448, %450 : vector<16x2xf32>
    %c0_96 = arith.constant 0 : index
    %c0_97 = arith.constant 0 : index
    %452 = vector.load %arg16[%c0_96, %c0_97] : memref<16x2xf32, #tpu.memory_space<vmem>>, vector<16x2xf32>
    tpu.vector_store %arg16[%c0_96, %c0_97], %451 {strides = array<i32>} : memref<16x2xf32, #tpu.memory_space<vmem>>, vector<16x2xf32>,
    return
  }
}

</mosaic_0001>

<bundles_post_ra>
// kernel: tpu_custom_call.1
= control target key start
LH: loop header
LB: loop body
LE: loop exit
PB: predicated region body
PF: predicated region fallthrough
CT: control target
= control target key end

     0   :  { %vm107_vm0 = vcmask 392192   ;;  %v275_v25 = vlaneseq  ;;  %vm268_vm1 = vcmask 1043456   ;;  %vm283_vm2 = vcmask 1041408   ;;  %s3139_s1 = inlined_call_operand.vmem [shape: bf16[48,128], index: 1, kind: input, shape index: {}]   ;;  %s3140_s0 = inlined_call_operand.vmem [shape: f32[16,48], index: 0, kind: input, shape index: {}]   ;;  %s3141_s3 = inlined_call_operand.vmem [shape: bf16[128,64], index: 3, kind: input, shape index: {}]   ;;  %s3142_s2 = inlined_call_operand.vmem [shape: f32[1,128], index: 2, kind: input, shape index: {}]   ;;  %s3143_s5 = inlined_call_operand.vmem [shape: bf16[64,128], index: 5, kind: input, shape index: {}]   ;;  %s3144_s7 = inlined_call_operand.vmem [shape: bf16[128,64], index: 7, kind: input, shape index: {}]   ;;  %s3145_s4 = inlined_call_operand.vmem [shape: f32[5,64], index: 4, kind: input, shape index: {}]   ;;  %s3146_s6 = inlined_call_operand.vmem [shape: f32[1,128], index: 6, kind: input, shape index: {}]   ;;  %s3147_s9 = inlined_call_operand.vmem [shape: bf16[64,256], index: 9, kind: input, shape index: {}]   ;;  %s3148_s11 = inlined_call_operand.vmem [shape: bf16[64,256], index: 11, kind: input, shape index: {}]   ;;  %s3149_s8 = inlined_call_operand.vmem [shape: f32[5,64], index: 8, kind: input, shape index: {}]   ;;  %s3150_s12 = inlined_call_operand.vmem [shape: f32[1,256], index: 12, kind: input, shape index: {}]   ;;  %s3151_s10 = inlined_call_operand.vmem [shape: f32[1,256], index: 10, kind: input, shape index: {}]   ;;  %s3152_s14 = inlined_call_operand.vmem [shape: f32[64,2], index: 14, kind: input, shape index: {}]   ;;  %s3153_s13 = inlined_call_operand.vmem [shape: f32[1,64], index: 13, kind: input, shape index: {}]   ;;  %s3154_s15 = inlined_call_operand.vmem [shape: f32[1,2], index: 15, kind: input, shape index: {}]   ;;  %s3155_s16 = inlined_call_operand.vmem [shape: f32[16,2], index: 16, kind: output, shape index: {}]  }
   0x1   :  { %3157 = sst [smem:[#allocation2_spill]] %s3139_s1  ;;  %v53_v2 = vld [vmem:[%s3140_s0] sm:$0xff]  ;;  %v1978_v4 = vld [vmem:[%s3141_s3 + $0x8] sm:$0xff]   ;;  %v1979_v6 = vld [vmem:[%s3141_s3 + $0x10] sm:$0xff]   ;;  %vm306_vm3 = vcmask 1045504   ;;  %vm387_vm4 = vcmask 523264  }
   0x2   :  { %s3158_s23 = sld [smem:[#allocation2_spill]]  ;;  %v1897_v3 = vld [vmem:[%s3141_s3] sm:$0xff]   ;;  %2071 = vmatprep.mubr.msk.f32.mxu0 %vm107_vm0, %v53_v2  ;;  %v54_v7 = vld [vmem:[%s3140_s0 + $0x8] sm:$0xff]  ;;  %v1980_v8 = vld [vmem:[%s3141_s3 + $0x18] sm:$0xff]   ;;  %v2774_v26 = vshrl.u32 %v275_v25, 7  ;;  %vm1843_vm5 = vcmask 15360  }
   0x3   :  { %2195 = vmatprep.subr.bf16.mxu1 %v1897_v3  ;;  %v1981_v9 = vld [vmem:[%s3141_s3 + $0x20] sm:$0xff]   ;;  %v1982_v10 = vld [vmem:[%s3141_s3 + $0x28] sm:$0xff]   ;;  %v1983_v11 = vld [vmem:[%s3141_s3 + $0x30] sm:$0xff]  }
   0x4   :  { %2197 = vmatpush3.bf16.msra.mxu1 %v1897_v3  ;;  %v1984_v12 = vld [vmem:[%s3141_s3 + $0x38] sm:$0xff]   ;;  %v1850_v13 = vld [vmem:[%s3142_s2] ss:$0 sm:$0xff]  ;;  %v1985_v21 = vld [vmem:[%s3143_s5 + $0x8] sm:$0xff]   ;;  %v2777_v27 = vsub.s32 0, %v2774_v26  ;;  %v2780_v28 = vsub.s32 1, %v2774_v26 }
   0x5   :  { %2199 = vmatprep.subr.bf16.mxu1 %v1978_v4  ;;  %v1929_v20 = vld [vmem:[%s3143_s5] sm:$0xff]   ;;  %v1986_v22 = vld [vmem:[%s3143_s5 + $0x10] sm:$0xff]   ;;  %v1987_v23 = vld [vmem:[%s3143_s5 + $0x18] sm:$0xff]   ;;  %v300_v31 = vsub.s32 2, %v2774_v26  ;;  %v315_v40 = vsub.s32 3, %v2774_v26  ;;  %v325_v45 = vsub.s32 4, %v2774_v26 }
   0x6   :  { %v1945_v24 = vld [vmem:[%s3144_s7] sm:$0xff]   ;;  %v2511_v25 = vld [vmem:[%s3147_s9 + $0x14] ss:$8 sps:$4 sm:$0xff]  }
   0x7   :  { %v100_v29 = vld [vmem:[%s3145_s4] sm:$0x1f] }
   0x8   :  { %v1885_v0 = vld [vmem:[%s3158_s23] sm:$0xff]   ;;  %v1976_v1 = vld [vmem:[%s3158_s23 + $0x8] sm:$0xff]   ;;  %v1977_v5 = vld [vmem:[%s3158_s23 + $0x10] sm:$0xff]   ;;  %2201 = vmatpush3.bf16.msra.mxu1 %v1978_v4  ;;  %v278_v35 = vrot.slane %v100_v29, %v2777_v27  ;;  %v293_v41 = vrot.slane %v100_v29, %v2780_v28  ;;  %v301_v42 = vrot.slane %v100_v29, %v300_v31  ;;  %v316_v51 = vrot.slane %v100_v29, %v315_v40 }
   0x9   :  { %2183 = vmatprep.subr.bf16.mxu0 %v1885_v0  ;;  %2203 = vmatprep.subr.bf16.mxu1 %v1979_v6  ;;  %v326_v57 = vrot.slane %v100_v29, %v325_v45  ;;  %v2513_v29 = vld [vmem:[%s3147_s9 + $0x10] ss:$8 sps:$4 sm:$0xff]  }
   0xa   :  { %2185 = vmatpush3.bf16.msra.mxu0 %v1885_v0 }
   0xb   :  { %2187 = vmatprep.subr.bf16.mxu0 %v1976_v1 }
   0xc   :  { %2205 = vmatpush3.bf16.msra.mxu1 %v1979_v6 }
   0xd   :  { %2207 = vmatprep.subr.bf16.mxu1 %v1980_v8 }
   0xe   :  { %2189 = vmatpush3.bf16.msra.mxu0 %v1976_v1 }
   0xf   :  { %2191 = vmatprep.subr.bf16.mxu0 %v1977_v5 }
  0x10   :  { %2209 = vmatpush3.bf16.msra.mxu1 %v1980_v8 }
  0x11   :  { %2211 = vmatprep.subr.bf16.mxu1 %v1981_v9 }
  0x12   :  { %2193 = vmatpush3.bf16.msra.mxu0 %v1977_v5 }
  0x13   :  { %2227 = vmatprep.subr.bf16.mxu0 %v1929_v20 }
  0x14   :  { %2213 = vmatpush3.bf16.msra.mxu1 %v1981_v9  ;;  %v1988_v9 = vld [vmem:[%s3144_s7 + $0x8] sm:$0xff]  }
  0x15   :  { %2072 = vmatmul.mubr.msk.f32.vlgmr.msra.gmra.mrb[0].mxu0 %vm107_vm0, %v54_v7  ;;  %2215 = vmatprep.subr.bf16.mxu1 %v1982_v10 }
  0x16   :  { %2229 = vmatpush3.bf16.msra.mxu0 %v1929_v20 }
  0x17   :  { %2231 = vmatprep.subr.bf16.mxu0 %v1985_v21 }
  0x18   :  { %2217 = vmatpush3.bf16.msra.mxu1 %v1982_v10  ;;  %v1989_v10 = vld [vmem:[%s3144_s7 + $0x10] sm:$0xff]  }
  0x19   :  { %2219 = vmatprep.subr.bf16.mxu1 %v1983_v11 }
  0x1a   :  { %2233 = vmatpush3.bf16.msra.mxu0 %v1985_v21 }
  0x1b   :  { %2235 = vmatprep.subr.bf16.mxu0 %v1986_v22 }
  0x1c   :  { %2221 = vmatpush3.bf16.msra.mxu1 %v1983_v11  ;;  %v1990_v11 = vld [vmem:[%s3144_s7 + $0x18] sm:$0xff]  }
  0x1d   :  { %2223 = vmatprep.subr.bf16.mxu1 %v1984_v12 }
  0x1e   :  { %2237 = vmatpush3.bf16.msra.mxu0 %v1986_v22 }
  0x1f   :  { %2239 = vmatprep.subr.bf16.mxu0 %v1987_v23 }
  0x20   :  { %2225 = vmatpush3.bf16.msra.mxu1 %v1984_v12  ;;  %v1991_v12 = vld [vmem:[%s3144_s7 + $0x20] sm:$0xff]  }
  0x22   :  { %2241 = vmatpush3.bf16.msra.mxu0 %v1987_v23  ;;  %v2508_v23 = vld [vmem:[%s3147_s9 + $0x4] ss:$8 sps:$4 sm:$0xff]  }
  0x23   :  { %2243 = vmatprep.subr.bf16.mxu0 %v1945_v24  ;;  %2275 = vmatprep.subr.bf16.mxu1 %v2508_v23 }
  0xe8   :  { %v2073_v14 = vpop.f32.mrb[0].mxu0 }
  0xe9   :  { %v186_v15 = vadd.f32 %v2073_v14, %v1850_v13  ;;  %v180_v16 = vpop.f32.mrb[1].mxu0  ;;  %v1993_v14 = vld [vmem:[%s3144_s7 + $0x30] sm:$0xff]  }
  0xea   :  { %v181_v17 = vadd.f32 %v1850_v13, %v180_v16  ;;  %v1992_v13 = vld [vmem:[%s3144_s7 + $0x28] sm:$0xff]   ;;  %v1853_v16 = vld [vmem:[%s3146_s6] ss:$0 sm:$0xff] }
  0xeb   :  { %v190_v19 = vmax.f32 %v186_v15, 0.0  ;;  %v1994_v15 = vld [vmem:[%s3144_s7 + $0x38] sm:$0xff]  }
  0xec   :  { %v189_v18 = vmax.f32 %v181_v17, 0.0 }
  0xee   :  { %2106 = vmatprep.mubr.f32.mxu1 %v189_v18 }
  0xef   :  { %2107 = vmatmul.mubr.f32.vlgmr.msra.gmra.mrb[0].mxu1 %v190_v19 }
 0x1c2   :  { %v2108_v30 = vpop.f32.mrb[0].mxu1 }
 0x1c3   :  { %v270_v32 = vrot.slane %v2108_v30, 4  ;;  %v285_v33 = vrot.slane %v2108_v30, 6  ;;  %v257_v34 = vpop.f32.mrb[1].mxu1  ;;  %v308_v36 = vrot.slane %v2108_v30, 2  ;;  %v303_v60 = vmul.f32 %v2108_v30, %v301_v42 }
 0x1c4   :  { %v269_v37 = vrot.slane %v257_v34, 4  ;;  %v284_v38 = vrot.slane %v257_v34, 6  ;;  %v307_v39 = vrot.slane %v257_v34, 2  ;;  %v302_v59 = vmul.f32 %v301_v42, %v257_v34  ;;  %v2895_v42 = vld [vmem:[%s3148_s11 + $0x20] ss:$8 sps:$4 sm:$0xff]  }
 0x1c5   :  { %v312_v56 = vsel %vm306_vm3, %v308_v36, 0.0  ;;  %v322_v62 = vsel %vm268_vm1, %v270_v32, 0.0 }
 0x1c6   :  { %v274_v43 = vsel %vm268_vm1, 0.0, %v269_v37  ;;  %v286_v44 = vsel %vm283_vm2, %v284_v38, %v285_v33  ;;  %v289_v47 = vsel %vm283_vm2, 0.0, %v284_v38  ;;  %v271_v48 = vsel %vm268_vm1, %v269_v37, %v270_v32  ;;  %v2516_v32 = vld [vmem:[%s3147_s9 + $0x20] ss:$8 sps:$4 sm:$0xff]   ;;  %v2517_v33 = vld [vmem:[%s3147_s9 + $0x34] ss:$8 sps:$4 sm:$0xff]  }
 0x1c7   :  { %v279_v46 = vmul.f32 %v278_v35, %v274_v43  ;;  %v280_v49 = vmul.f32 %v278_v35, %v271_v48  ;;  %v309_v50 = vsel %vm306_vm3, %v307_v39, %v308_v36  ;;  %v294_v53 = vmul.f32 %v293_v41, %v289_v47  ;;  %v2863_v36 = vld [vmem:[%s3148_s11 + $0x4] ss:$8 sps:$4 sm:$0xff]   ;;  %v2871_v37 = vld [vmem:[%s3148_s11] ss:$8 sps:$4 sm:$0xff]   ;;  %v2876_v38 = vld [vmem:[%s3148_s11 + $0x14] ss:$8 sps:$4 sm:$0xff]  }
 0x1c8   :  { %v295_v54 = vmul.f32 %v293_v41, %v286_v44  ;;  %v317_v0 = vmul.f32 %v316_v51, %v309_v50  ;;  %v318_v1 = vmul.f32 %v316_v51, %v312_v56  ;;  %v327_v4 = vmul.f32 %v326_v57, %v271_v48  ;;  %v2883_v39 = vld [vmem:[%s3148_s11 + $0x10] ss:$8 sps:$4 sm:$0xff]   ;;  %v2888_v41 = vld [vmem:[%s3148_s11 + $0x24] ss:$8 sps:$4 sm:$0xff]   ;;  %v2900_v43 = vld [vmem:[%s3148_s11 + $0x34] ss:$8 sps:$4 sm:$0xff]  }
 0x1c9   :  { %v281_v52 = vadd.f32 %v279_v46, %v257_v34  ;;  %v282_v55 = vadd.f32 %v2108_v30, %v280_v49  ;;  %v328_v5 = vmul.f32 %v326_v57, %v322_v62  ;;  %v2514_v30 = vld [vmem:[%s3147_s9 + $0x24] ss:$8 sps:$4 sm:$0xff]   ;;  %v2519_v34 = vld [vmem:[%s3147_s9 + $0x30] ss:$8 sps:$4 sm:$0xff]   ;;  %v2628_v35 = vmov 0.0  }
 0x1ca   :  { %716 = vmatprep.mubr.f32.mxu1 %v2628_v35  ;;  %v2907_v44 = vld [vmem:[%s3148_s11 + $0x30] ss:$8 sps:$4 sm:$0xff]   ;;  %v380_v46 = vld [vmem:[%s3149_s8] sm:$0x1f] }
 0x1cb   :  { %v296_v58 = vadd.f32 %v294_v53, %v281_v52  ;;  %v297_v61 = vadd.f32 %v295_v54, %v282_v55  ;;  %v557_v51 = vrot.slane %v380_v46, %v2777_v27  ;;  %v571_v56 = vrot.slane %v380_v46, %v2780_v28 }
 0x1cd   :  { %v304_v63 = vadd.f32 %v302_v59, %v296_v58  ;;  %v305_v2 = vadd.f32 %v303_v60, %v297_v61  ;;  %v579_v60 = vrot.slane %v380_v46, %v300_v31 }
 0x1cf   :  { %v319_v3 = vadd.f32 %v317_v0, %v304_v63  ;;  %v320_v6 = vadd.f32 %v318_v1, %v305_v2  ;;  %v593_v0 = vrot.slane %v380_v46, %v315_v40 }
 0x1d1   :  { %v2803_v7 = vadd.f32 %v327_v4, %v319_v3  ;;  %v2805_v8 = vadd.f32 %v328_v5, %v320_v6 }
 0x1d3   :  { %2125 = vmatprep.mubr.msk.f32.mxu0 %vm387_vm4, %v2803_v7 }
 0x1d4   :  { %2126 = vmatmul.mubr.msk.f32.vlgmr.msra.gmra.mrb[2].mxu0 %vm387_vm4, %v2805_v8 }
 0x1d5   :  { %2245 = vmatpush3.bf16.msra.mxu0 %v1945_v24  ;;  %v2510_v24 = vld [vmem:[%s3147_s9] ss:$8 sps:$4 sm:$0xff]  }
 0x1d6   :  { %2247 = vmatprep.subr.bf16.mxu0 %v1988_v9  ;;  %2277 = vmatpush1.bf16.msra.mxu1 %v2510_v24 }
 0x1d7   :  { %2279 = vmatprep.subr.bf16.mxu1 %v2511_v25 }
 0x1d9   :  { %2249 = vmatpush3.bf16.msra.mxu0 %v1988_v9  ;;  %v603_v9 = vrot.slane %v380_v46, %v325_v45  ;;  %v753_v45 = vld [vmem:[%s3150_s12] sm:$0x3] }
 0x1da   :  { %2251 = vmatprep.subr.bf16.mxu0 %v1989_v10  ;;  %2281 = vmatpush1.bf16.msra.mxu1 %v2513_v29  ;;  %v759_v46 = vrot.slane %v753_v45, %v2777_v27 }
 0x1db   :  { %2283 = vmatprep.subr.bf16.mxu1 %v2514_v30 }
 0x1dd   :  { %2253 = vmatpush3.bf16.msra.mxu0 %v1989_v10 }
 0x1de   :  { %2255 = vmatprep.subr.bf16.mxu0 %v1990_v11  ;;  %2285 = vmatpush1.bf16.msra.mxu1 %v2516_v32 }
 0x1df   :  { %2287 = vmatprep.subr.bf16.mxu1 %v2517_v33 }
 0x1e1   :  { %2257 = vmatpush3.bf16.msra.mxu0 %v1990_v11 }
 0x1e2   :  { %2259 = vmatprep.subr.bf16.mxu0 %v1991_v12  ;;  %2289 = vmatpush1.bf16.msra.mxu1 %v2519_v34 }
 0x1e3   :  { %2291 = vmatprep.subr.bf16.mxu1 %v2863_v36 }
 0x1e5   :  { %2261 = vmatpush3.bf16.msra.mxu0 %v1991_v12 }
 0x1e6   :  { %2263 = vmatprep.subr.bf16.mxu0 %v1992_v13 }
 0x1e9   :  { %2265 = vmatpush3.bf16.msra.mxu0 %v1992_v13 }
 0x1ea   :  { %2267 = vmatprep.subr.bf16.mxu0 %v1993_v14 }
 0x1ed   :  { %2269 = vmatpush3.bf16.msra.mxu0 %v1993_v14 }
 0x1ee   :  { %2271 = vmatprep.subr.bf16.mxu0 %v1994_v15 }
 0x1f1   :  { %2273 = vmatpush3.bf16.msra.mxu0 %v1994_v15 }
 0x1f2   :  { %2307 = vmatprep.subr.bf16.mxu0 %v2863_v36 }
 0x2a7   :  { %v2127_v17 = vpop.f32.mrb[2].mxu0 }
 0x2a8   :  { %v466_v18 = vadd.f32 %v2127_v17, %v1853_v16  ;;  %v460_v19 = vpop.f32.mrb[3].mxu0 }
 0x2a9   :  { %v461_v20 = vadd.f32 %v1853_v16, %v460_v19 }
 0x2aa   :  { %v470_v22 = vmax.f32 %v466_v18, 0.0 }
 0x2ab   :  { %v469_v21 = vmax.f32 %v461_v20, 0.0 }
 0x2ad   :  { %2160 = vmatprep.mubr.f32.mxu0 %v469_v21 }
 0x2ae   :  { %2161 = vmatmul.mubr.f32.vlgmr.msra.gmra.mrb[4].mxu0 %v470_v22 }
 0x2af   :  { %963 = vmatprep.mubr.f32.mxu0 %v2628_v35  ;;  %2309 = vmatpush1.bf16.msra.mxu0 %v2871_v37 }
 0x2b0   :  { %2311 = vmatprep.subr.bf16.mxu0 %v2876_v38 }
 0x2b3   :  { %2313 = vmatpush1.bf16.msra.mxu0 %v2883_v39 }
 0x2b4   :  { %2315 = vmatprep.subr.bf16.mxu0 %v2888_v41 }
 0x2b7   :  { %2317 = vmatpush1.bf16.msra.mxu0 %v2895_v42 }
 0x2b8   :  { %2319 = vmatprep.subr.bf16.mxu0 %v2900_v43 }
 0x2bb   :  { %2321 = vmatpush1.bf16.msra.mxu0 %v2907_v44 }
 0x2bc   :  { %2339 = vmatprep.subr.bf16.mxu0 %v2863_v36 }
 0x381   :  { %v2162_v47 = vpop.f32.mrb[4].mxu0 }
 0x382   :  { %v549_v48 = vrot.slane %v2162_v47, 4  ;;  %v563_v49 = vrot.slane %v2162_v47, 6  ;;  %v537_v50 = vpop.f32.mrb[5].mxu0  ;;  %v585_v52 = vrot.slane %v2162_v47, 2  ;;  %v581_v10 = vmul.f32 %v2162_v47, %v579_v60 }
 0x383   :  { %v548_v53 = vrot.slane %v537_v50, 4  ;;  %v562_v54 = vrot.slane %v537_v50, 6  ;;  %v584_v55 = vrot.slane %v537_v50, 2  ;;  %v580_v11 = vmul.f32 %v579_v60, %v537_v50 }
 0x384   :  { %v589_v6 = vsel %vm306_vm3, %v585_v52, 0.0  ;;  %v599_v13 = vsel %vm268_vm1, %v549_v48, 0.0 }
 0x385   :  { %v550_v57 = vsel %vm268_vm1, %v548_v53, %v549_v48  ;;  %v553_v58 = vsel %vm268_vm1, 0.0, %v548_v53  ;;  %v564_v59 = vsel %vm283_vm2, %v562_v54, %v563_v49  ;;  %v567_v63 = vsel %vm283_vm2, 0.0, %v562_v54 }
 0x386   :  { %v558_v61 = vmul.f32 %v557_v51, %v553_v58  ;;  %v559_v62 = vmul.f32 %v557_v51, %v550_v57  ;;  %v586_v1 = vsel %vm306_vm3, %v584_v55, %v585_v52  ;;  %v572_v4 = vmul.f32 %v571_v56, %v567_v63 }
 0x387   :  { %v573_v5 = vmul.f32 %v571_v56, %v564_v59  ;;  %v595_v14 = vmul.f32 %v593_v0, %v589_v6  ;;  %v594_v40 = vmul.f32 %v593_v0, %v586_v1  ;;  %v604_v18 = vmul.f32 %v603_v9, %v550_v57 }
 0x388   :  { %v560_v2 = vadd.f32 %v558_v61, %v537_v50  ;;  %v561_v3 = vadd.f32 %v2162_v47, %v559_v62  ;;  %v605_v20 = vmul.f32 %v603_v9, %v599_v13  ;;  %v763_v48 = vrot.slane %v753_v45, %v2780_v28 }
 0x38a   :  { %v574_v31 = vadd.f32 %v572_v4, %v560_v2  ;;  %v575_v12 = vadd.f32 %v573_v5, %v561_v3 }
 0x38c   :  { %v582_v15 = vadd.f32 %v580_v11, %v574_v31  ;;  %v583_v16 = vadd.f32 %v581_v10, %v575_v12 }
 0x38e   :  { %v596_v17 = vadd.f32 %v594_v40, %v582_v15  ;;  %v597_v19 = vadd.f32 %v595_v14, %v583_v16 }
 0x390   :  { %v606_v21 = vadd.f32 %v604_v18, %v596_v17  ;;  %v607_v22 = vadd.f32 %v605_v20, %v597_v19 }
 0x392   :  { %v608_v23 = vadd.f32 %v606_v21, %v2803_v7  ;;  %v609_v26 = vadd.f32 %v607_v22, %v2805_v8  ;;  %v634_v7 = vld [vmem:[%s3151_s10] sm:$0x3]  ;;  %v768_v8 = vsub.f32 1.0, %v753_v45  ;;  %s2629_s10 = smov 64  }
 0x393   :  { %v639_v24 = vrot.slane %v634_v7, %v2777_v27  ;;  %v643_v25 = vrot.slane %v634_v7, %v2780_v28 }
 0x394   :  { %1856 = vmatmul.mubr.msk.f32.vlgmr.msra.gmra.mrb[2].mxu1 %vm387_vm4, %v608_v23  ;;  %v773_v29 = vrot.slane %v768_v8, %v2777_v27  ;;  %v777_v32 = vrot.slane %v768_v8, %v2780_v28 }
 0x395   :  { %2293 = vmatpush1.bf16.msra.mxu1 %v2871_v37  ;;  %722 = vmatprep.mubr.f32.mxu1 %v2628_v35 }
 0x396   :  { %2295 = vmatprep.subr.bf16.mxu1 %v2876_v38 }
 0x398   :  { %1857 = vmatmul.mubr.msk.f32.gmra.mrb[4].mxu1 %vm387_vm4, %v609_v26 }
 0x399   :  { %2297 = vmatpush1.bf16.msra.mxu1 %v2883_v39  ;;  %857 = vmatprep.mubr.f32.mxu1 %v2628_v35 }
 0x39a   :  { %2299 = vmatprep.subr.bf16.mxu1 %v2888_v41 }
 0x39d   :  { %2301 = vmatpush1.bf16.msra.mxu1 %v2895_v42 }
 0x39e   :  { %2303 = vmatprep.subr.bf16.mxu1 %v2900_v43 }
 0x3a1   :  { %2305 = vmatpush1.bf16.msra.mxu1 %v2907_v44 }
 0x3a2   :  { %2323 = vmatprep.subr.bf16.mxu1 %v2863_v36 }
 0x3a4   :  { %858 = vmatmul.mubr.f32.vlgmr.msra.gmra.mrb[6].mxu1 %v2628_v35 }
 0x3a5   :  { %2325 = vmatpush1.bf16.msra.mxu1 %v2871_v37  ;;  %1073 = vmatprep.mubr.f32.mxu1 %v2628_v35 }
 0x3a6   :  { %2327 = vmatprep.subr.bf16.mxu1 %v2876_v38 }
 0x3a9   :  { %2329 = vmatpush1.bf16.msra.mxu1 %v2883_v39 }
 0x3aa   :  { %2331 = vmatprep.subr.bf16.mxu1 %v2888_v41 }
 0x3ad   :  { %2333 = vmatpush1.bf16.msra.mxu1 %v2895_v42 }
 0x3ae   :  { %2335 = vmatprep.subr.bf16.mxu1 %v2900_v43 }
 0x3b1   :  { %2337 = vmatpush1.bf16.msra.mxu1 %v2907_v44 }
 0x3b2   :  { %2355 = vmatprep.subr.bf16.mxu1 %v2863_v36 }
 0x467   :  { %v718_v30 = vpop.f32.mrb[2].mxu1 }
 0x468   :  { %v719_v33 = vadd.f32 %v718_v30, %v639_v24  ;;  %v720_v34 = vpop.f32.mrb[3].mxu1 }
 0x469   :  { %v721_v47 = vadd.f32 %v720_v34, %v643_v25 }
 0x46a   :  { %v1225_v49 = vmul.f32 %v773_v29, %v719_v33  ;;  %v766_v54 = vmul.f32 %v759_v46, %v719_v33 }
 0x46b   :  { %v1226_v50 = vmul.f32 %v777_v32, %v721_v47  ;;  %v724_v51 = vpop.f32.mrb[4].mxu1  ;;  %v767_v55 = vmul.f32 %v763_v48, %v721_v47 }
 0x46c   :  { %v725_v52 = vadd.f32 %v724_v51, %v639_v24  ;;  %v726_v53 = vpop.f32.mrb[5].mxu1  ;;  %v1339_v57 = vrot.slane %v1225_v49, 2  ;;  %v1229_v60 = vrot.slane %v1225_v49, 6 }
 0x46d   :  { %v727_v56 = vadd.f32 %v726_v53, %v643_v25  ;;  %v1340_v61 = vrot.slane %v1226_v50, 2  ;;  %v1230_v0 = vrot.slane %v1226_v50, 6 }
 0x46e   :  { %v780_v58 = vmul.f32 %v773_v29, %v725_v52  ;;  %v1223_v59 = vmul.f32 %v759_v46, %v725_v52 }
 0x46f   :  { %v781_v62 = vmul.f32 %v777_v32, %v727_v56  ;;  %v1224_v63 = vmul.f32 %v763_v48, %v727_v56 }
 0x470   :  { %v888_v1 = vrot.slane %v780_v58, 2  ;;  %v784_v2 = vrot.slane %v780_v58, 6  ;;  %v2965_v3 = vadd.f32 %v1229_v60, %v1223_v59  ;;  %v2967_v28 = vadd.f32 %v1339_v57, %v1223_v59 }
 0x471   :  { %v889_v4 = vrot.slane %v781_v62, 2  ;;  %v785_v5 = vrot.slane %v781_v62, 6  ;;  %v2969_v6 = vadd.f32 %v1230_v0, %v1224_v63  ;;  %v2971_v9 = vadd.f32 %v1340_v61, %v1224_v63 }
 0x472   :  { %v2973_v10 = vadd.f32 %v784_v2, %v766_v54  ;;  %v2975_v31 = vadd.f32 %v888_v1, %v766_v54 }
 0x473   :  { %v2977_v11 = vadd.f32 %v785_v5, %v767_v55  ;;  %v2979_v12 = vadd.f32 %v889_v4, %v767_v55 }
 0x477   :  { %v859_v13 = vpop.f32.mrb[6].mxu1 }
 0x478   :  { %v864_v14 = vadd.f32 %v859_v13, %v2973_v10  ;;  %v861_v15 = vpop.f32.mrb[7].mxu1 }
 0x479   :  { %v865_v16 = vadd.f32 %v861_v15, %v2977_v11 }
 0x47a   :  { %v1858_v40 = vmul.f32 -1.442695, %v864_v14 }
 0x47b   :  { %v1859_v22 = vmul.f32 -1.442695, %v865_v16 }
 0x47c   :  { %2532 = vpow2.f32 %v1858_v40 }
 0x47d   :  { %2534 = vtanh.f32 %v865_v16 }
 0x486   :  { %v2533_v17 = vpop.eup %2532 }
 0x487   :  { %v869_v18 = vadd.f32 1.0, %v2533_v17  ;;  %v2535_v19 = vpop.eup %2534 }
 0x489   :  { %2536 = vrcp.f32 %v869_v18 }
 0x48a   :  { %2538 = vpow2.f32 %v1859_v22 }
 0x493   :  { %v2537_v20 = vpop.eup %2536 }
 0x494   :  { %v880_v21 = vmul.f32 %v2537_v20, %v2535_v19  ;;  %v2539_v23 = vpop.eup %2538  ;;  %v879_v45 = vmul.f32 0.0, %v2537_v20 }
 0x495   :  { %v876_v26 = vadd.f32 1.0, %v2539_v23 }
 0x496   :  { %882 = vrot.lane.b32.xlu0 %v880_v21, %s2629_s10 }
 0x497   :  { %2540 = vrcp.f32 %v876_v26 }
 0x4a1   :  { %v2541_v24 = vpop.eup %2540 }
 0x508   :  { %v883_v7 = vpop.permute.xlu0 %882 }
 0x509   :  { %v885_v8 = vadd.f32 %v883_v7, %v879_v45 }
 0x50b   :  { %2542 = vtanh.f32 %v885_v8  ;;  %v992_v53 = vrot.slane %v885_v8, 6 }
 0x515   :  { %v2543_v25 = vpop.eup %2542 }
 0x516   :  { %v887_v29 = vmul.f32 %v2543_v25, %v2541_v24 }
 0x518   :  { %895 = vrot.lane.b32.xlu0 %v887_v29, %s2629_s10 }
 0x58a   :  { %v2985_v30 = vpop.permute.xlu0 %895 }
 0x58b   :  { %1860 = vmatmul.mubr.msk.f32.vlgmr.msra.gmra.mrb[6].mxu0 %vm387_vm4, %v2985_v30 }
 0x58c   :  { %2341 = vmatpush1.bf16.msra.mxu0 %v2871_v37  ;;  %1183 = vmatprep.mubr.f32.mxu0 %v2628_v35 }
 0x58d   :  { %2343 = vmatprep.subr.bf16.mxu0 %v2876_v38 }
 0x590   :  { %2345 = vmatpush1.bf16.msra.mxu0 %v2883_v39 }
 0x591   :  { %2347 = vmatprep.subr.bf16.mxu0 %v2888_v41 }
 0x594   :  { %2349 = vmatpush1.bf16.msra.mxu0 %v2895_v42 }
 0x595   :  { %2351 = vmatprep.subr.bf16.mxu0 %v2900_v43 }
 0x598   :  { %2353 = vmatpush1.bf16.msra.mxu0 %v2907_v44 }
 0x599   :  { %2371 = vmatprep.subr.bf16.mxu0 %v2863_v36 }
 0x65e   :  { %v965_v32 = vpop.f32.mrb[6].mxu0 }
 0x65f   :  { %v972_v33 = vrot.slane %v965_v32, 6  ;;  %v967_v34 = vpop.f32.mrb[7].mxu0 }
 0x660   :  { %v973_v48 = vrot.slane %v967_v34, 6 }
 0x661   :  { %v976_v46 = vadd.f32 %v972_v33, %v2975_v31 }
 0x662   :  { %v977_v49 = vadd.f32 %v973_v48, %v2979_v12 }
 0x663   :  { %v1861_v47 = vmul.f32 -1.442695, %v976_v46 }
 0x664   :  { %v1862_v57 = vmul.f32 -1.442695, %v977_v49 }
 0x665   :  { %2544 = vpow2.f32 %v1861_v47 }
 0x666   :  { %2546 = vtanh.f32 %v977_v49 }
 0x66f   :  { %v2545_v50 = vpop.eup %2544 }
 0x670   :  { %v981_v51 = vadd.f32 1.0, %v2545_v50  ;;  %v2547_v52 = vpop.eup %2546 }
 0x672   :  { %2548 = vrcp.f32 %v981_v51 }
 0x673   :  { %2550 = vpow2.f32 %v1862_v57 }
 0x67c   :  { %v2549_v54 = vpop.eup %2548 }
 0x67d   :  { %v995_v55 = vmul.f32 %v2549_v54, %v2547_v52  ;;  %v994_v56 = vmul.f32 %v2549_v54, %v992_v53  ;;  %v2551_v58 = vpop.eup %2550 }
 0x67e   :  { %v988_v59 = vadd.f32 1.0, %v2551_v58 }
 0x67f   :  { %997 = vrot.lane.b32.xlu1 %v995_v55, %s2629_s10 }
 0x680   :  { %2552 = vrcp.f32 %v988_v59 }
 0x68a   :  { %v2553_v62 = vpop.eup %2552 }
 0x6f1   :  { %v998_v60 = vpop.permute.xlu1 %997 }
 0x6f2   :  { %v1000_v61 = vadd.f32 %v998_v60, %v994_v56 }
 0x6f4   :  { %2554 = vtanh.f32 %v1000_v61  ;;  %v1102_v20 = vrot.slane %v1000_v61, 6 }
 0x6fe   :  { %v2555_v63 = vpop.eup %2554 }
 0x6ff   :  { %v1002_v0 = vmul.f32 %v2555_v63, %v2553_v62 }
 0x701   :  { %v1004_v1 = vrot.slane %v1002_v0, 2 }
 0x703   :  { %1005 = vrot.lane.b32.xlu1 %v1004_v1, %s2629_s10 }
 0x775   :  { %v3002_v2 = vpop.permute.xlu1 %1005 }
 0x776   :  { %1863 = vmatmul.mubr.msk.f32.vlgmr.msra.gmra.mrb[8].mxu1 %vm387_vm4, %v3002_v2 }
 0x777   :  { %2357 = vmatpush1.bf16.msra.mxu1 %v2871_v37  ;;  %1305 = vmatprep.mubr.f32.mxu1 %v2628_v35 }
 0x778   :  { %2359 = vmatprep.subr.bf16.mxu1 %v2876_v38 }
 0x77b   :  { %2361 = vmatpush1.bf16.msra.mxu1 %v2883_v39 }
 0x77c   :  { %2363 = vmatprep.subr.bf16.mxu1 %v2888_v41 }
 0x77f   :  { %2365 = vmatpush1.bf16.msra.mxu1 %v2895_v42 }
 0x780   :  { %2367 = vmatprep.subr.bf16.mxu1 %v2900_v43 }
 0x783   :  { %2369 = vmatpush1.bf16.msra.mxu1 %v2907_v44 }
 0x784   :  { %2387 = vmatprep.subr.bf16.mxu1 %v2863_v36 }
 0x849   :  { %v1075_v4 = vpop.f32.mrb[8].mxu1 }
 0x84a   :  { %v1082_v5 = vrot.slane %v1075_v4, 4  ;;  %v1077_v13 = vpop.f32.mrb[9].mxu1 }
 0x84b   :  { %v1083_v40 = vrot.slane %v1077_v13, 4 }
 0x84c   :  { %v1086_v14 = vadd.f32 %v1082_v5, %v2973_v10 }
 0x84d   :  { %v1087_v16 = vadd.f32 %v1083_v40, %v2977_v11 }
 0x84e   :  { %v1864_v15 = vmul.f32 -1.442695, %v1086_v14 }
 0x84f   :  { %v1865_v26 = vmul.f32 -1.442695, %v1087_v16 }
 0x850   :  { %2556 = vpow2.f32 %v1864_v15 }
 0x851   :  { %2558 = vtanh.f32 %v1087_v16 }
 0x85a   :  { %v2557_v17 = vpop.eup %2556 }
 0x85b   :  { %v1091_v18 = vadd.f32 1.0, %v2557_v17  ;;  %v2559_v19 = vpop.eup %2558 }
 0x85d   :  { %2560 = vrcp.f32 %v1091_v18 }
 0x85e   :  { %2562 = vpow2.f32 %v1865_v26 }
 0x867   :  { %v2561_v21 = vpop.eup %2560 }
 0x868   :  { %v1105_v22 = vmul.f32 %v2561_v21, %v2559_v19  ;;  %v1104_v23 = vmul.f32 %v2561_v21, %v1102_v20  ;;  %v2563_v45 = vpop.eup %2562 }
 0x869   :  { %v1098_v10 = vadd.f32 1.0, %v2563_v45 }
 0x86a   :  { %1107 = vrot.lane.b32.xlu0 %v1105_v22, %s2629_s10 }
 0x86b   :  { %2564 = vrcp.f32 %v1098_v10 }
 0x875   :  { %v2565_v11 = vpop.eup %2564 }
 0x8dc   :  { %v1108_v7 = vpop.permute.xlu0 %1107 }
 0x8dd   :  { %v1110_v8 = vadd.f32 %v1108_v7, %v1104_v23 }
 0x8df   :  { %2566 = vtanh.f32 %v1110_v8  ;;  %v1212_v54 = vrot.slane %v1110_v8, 6 }
 0x8e9   :  { %v2567_v24 = vpop.eup %2566 }
 0x8ea   :  { %v1112_v25 = vmul.f32 %v2567_v24, %v2565_v11 }
 0x8ec   :  { %v1114_v29 = vrot.slane %v1112_v25, 4 }
 0x8ee   :  { %1115 = vrot.lane.b32.xlu1 %v1114_v29, %s2629_s10 }
 0x960   :  { %v3019_v32 = vpop.permute.xlu1 %1115 }
 0x961   :  { %1866 = vmatmul.mubr.msk.f32.vlgmr.msra.gmra.mrb[8].mxu0 %vm387_vm4, %v3019_v32 }
 0x962   :  { %2373 = vmatpush1.bf16.msra.mxu0 %v2871_v37  ;;  %1414 = vmatprep.mubr.f32.mxu0 %v2628_v35 }
 0x963   :  { %2375 = vmatprep.subr.bf16.mxu0 %v2876_v38 }
 0x966   :  { %2377 = vmatpush1.bf16.msra.mxu0 %v2883_v39 }
 0x967   :  { %2379 = vmatprep.subr.bf16.mxu0 %v2888_v41 }
 0x96a   :  { %2381 = vmatpush1.bf16.msra.mxu0 %v2895_v42 }
 0x96b   :  { %2383 = vmatprep.subr.bf16.mxu0 %v2900_v43 }
 0x96e   :  { %2385 = vmatpush1.bf16.msra.mxu0 %v2907_v44 }
 0x96f   :  { %2403 = vmatprep.subr.bf16.mxu0 %v2863_v36 }
 0xa34   :  { %v1185_v33 = vpop.f32.mrb[8].mxu0 }
 0xa35   :  { %v1192_v34 = vrot.slane %v1185_v33, 2  ;;  %v1187_v46 = vpop.f32.mrb[9].mxu0 }
 0xa36   :  { %v1193_v49 = vrot.slane %v1187_v46, 2 }
 0xa37   :  { %v1196_v47 = vadd.f32 %v1192_v34, %v2975_v31 }
 0xa38   :  { %v1197_v50 = vadd.f32 %v1193_v49, %v2979_v12 }
 0xa39   :  { %v1867_v48 = vmul.f32 -1.442695, %v1196_v47 }
 0xa3a   :  { %v1868_v36 = vmul.f32 -1.442695, %v1197_v50 }
 0xa3b   :  { %2568 = vpow2.f32 %v1867_v48 }
 0xa3c   :  { %2570 = vtanh.f32 %v1197_v50 }
 0xa45   :  { %v2569_v51 = vpop.eup %2568 }
 0xa46   :  { %v1201_v52 = vadd.f32 1.0, %v2569_v51  ;;  %v2571_v53 = vpop.eup %2570 }
 0xa48   :  { %2572 = vrcp.f32 %v1201_v52 }
 0xa49   :  { %2574 = vpow2.f32 %v1868_v36 }
 0xa52   :  { %v2573_v55 = vpop.eup %2572 }
 0xa53   :  { %v1215_v56 = vmul.f32 %v2573_v55, %v2571_v53  ;;  %v1214_v57 = vmul.f32 %v2573_v55, %v1212_v54  ;;  %v2575_v58 = vpop.eup %2574 }
 0xa54   :  { %v1208_v31 = vadd.f32 1.0, %v2575_v58 }
 0xa55   :  { %1217 = vrot.lane.b32.xlu0 %v1215_v56, %s2629_s10 }
 0xa56   :  { %2576 = vrcp.f32 %v1208_v31 }
 0xa60   :  { %v2577_v12 = vpop.eup %2576 }
 0xac7   :  { %v1218_v59 = vpop.permute.xlu0 %1217 }
 0xac8   :  { %v1220_v60 = vadd.f32 %v1218_v59, %v1214_v57 }
 0xaca   :  { %2578 = vtanh.f32 %v1220_v60  ;;  %v1328_v17 = vrot.slane %v1220_v60, 6 }
 0xad4   :  { %v2579_v61 = vpop.eup %2578 }
 0xad5   :  { %v1222_v62 = vmul.f32 %v2579_v61, %v2577_v12 }
 0xad7   :  { %v1236_v63 = vrot.slane %v1222_v62, 6 }
 0xad9   :  { %1237 = vrot.lane.b32.xlu1 %v1236_v63, %s2629_s10 }
 0xb4b   :  { %v3036_v0 = vpop.permute.xlu1 %1237 }
 0xb4c   :  { %1869 = vmatmul.mubr.msk.f32.vlgmr.msra.gmra.mrb[10].mxu1 %vm387_vm4, %v3036_v0 }
 0xb4d   :  { %2389 = vmatpush1.bf16.msra.mxu1 %v2871_v37  ;;  %1524 = vmatprep.mubr.f32.mxu1 %v2628_v35 }
 0xb4e   :  { %2391 = vmatprep.subr.bf16.mxu1 %v2876_v38 }
 0xb51   :  { %2393 = vmatpush1.bf16.msra.mxu1 %v2883_v39 }
 0xb52   :  { %2395 = vmatprep.subr.bf16.mxu1 %v2888_v41 }
 0xb55   :  { %2397 = vmatpush1.bf16.msra.mxu1 %v2895_v42 }
 0xb56   :  { %2399 = vmatprep.subr.bf16.mxu1 %v2900_v43 }
 0xb59   :  { %2401 = vmatpush1.bf16.msra.mxu1 %v2907_v44 }
 0xc1f   :  { %v1307_v1 = vpop.f32.mrb[10].mxu1 }
 0xc20   :  { %v1312_v4 = vadd.f32 %v1307_v1, %v2965_v3  ;;  %v1309_v5 = vpop.f32.mrb[11].mxu1 }
 0xc21   :  { %v1313_v14 = vadd.f32 %v1309_v5, %v2969_v6 }
 0xc22   :  { %v1870_v13 = vmul.f32 -1.442695, %v1312_v4 }
 0xc23   :  { %v1871_v21 = vmul.f32 -1.442695, %v1313_v14 }
 0xc24   :  { %2580 = vpow2.f32 %v1870_v13 }
 0xc25   :  { %2582 = vtanh.f32 %v1313_v14 }
 0xc2e   :  { %v2581_v15 = vpop.eup %2580 }
 0xc2f   :  { %v1317_v40 = vadd.f32 1.0, %v2581_v15  ;;  %v2583_v16 = vpop.eup %2582 }
 0xc31   :  { %2584 = vrcp.f32 %v1317_v40 }
 0xc32   :  { %2586 = vpow2.f32 %v1871_v21 }
 0xc3b   :  { %v2585_v18 = vpop.eup %2584 }
 0xc3c   :  { %v1331_v19 = vmul.f32 %v2585_v18, %v2583_v16  ;;  %v1330_v20 = vmul.f32 %v2585_v18, %v1328_v17  ;;  %v2587_v22 = vpop.eup %2586 }
 0xc3d   :  { %v1324_v23 = vadd.f32 1.0, %v2587_v22 }
 0xc3e   :  { %1333 = vrot.lane.b32.xlu0 %v1331_v19, %s2629_s10 }
 0xc3f   :  { %2588 = vrcp.f32 %v1324_v23 }
 0xc49   :  { %v2589_v10 = vpop.eup %2588 }
 0xcb0   :  { %v1334_v26 = vpop.permute.xlu0 %1333 }
 0xcb1   :  { %v1336_v45 = vadd.f32 %v1334_v26, %v1330_v20 }
 0xcb3   :  { %2590 = vtanh.f32 %v1336_v45 }
 0xcbd   :  { %v2591_v7 = vpop.eup %2590 }
 0xcbe   :  { %v1338_v8 = vmul.f32 %v2591_v7, %v2589_v10 }
 0xcc0   :  { %1346 = vrot.lane.b32.xlu1 %v1338_v8, %s2629_s10 }
 0xd32   :  { %v3052_v11 = vpop.permute.xlu1 %1346 }
 0xd33   :  { %1872 = vmatmul.mubr.msk.f32.vlgmr.msra.gmra.mrb[10].mxu0 %vm387_vm4, %v3052_v11 }
 0xd34   :  { %2405 = vmatpush1.bf16.msra.mxu0 %v2871_v37  ;;  %1634 = vmatprep.mubr.f32.mxu0 %v2628_v35 }
 0xd35   :  { %2407 = vmatprep.subr.bf16.mxu0 %v2876_v38 }
 0xd38   :  { %2409 = vmatpush1.bf16.msra.mxu0 %v2883_v39 }
 0xd39   :  { %2411 = vmatprep.subr.bf16.mxu0 %v2888_v41 }
 0xd3c   :  { %2413 = vmatpush1.bf16.msra.mxu0 %v2895_v42  ;;  %v1443_v42 = vrot.slane %v1336_v45, 6 }
 0xd3d   :  { %2415 = vmatprep.subr.bf16.mxu0 %v2900_v43 }
 0xd40   :  { %2417 = vmatpush1.bf16.msra.mxu0 %v2907_v44 }
 0xe06   :  { %v1416_v24 = vpop.f32.mrb[10].mxu0 }
 0xe07   :  { %v1423_v25 = vrot.slane %v1416_v24, 6  ;;  %v1418_v29 = vpop.f32.mrb[11].mxu0 }
 0xe08   :  { %v1424_v35 = vrot.slane %v1418_v29, 6 }
 0xe09   :  { %v1427_v33 = vadd.f32 %v1423_v25, %v2967_v28 }
 0xe0a   :  { %v1428_v38 = vadd.f32 %v1424_v35, %v2971_v9 }
 0xe0b   :  { %v1873_v37 = vmul.f32 -1.442695, %v1427_v33 }
 0xe0c   :  { %v1874_v44 = vmul.f32 -1.442695, %v1428_v38 }
 0xe0d   :  { %2592 = vpow2.f32 %v1873_v37 }
 0xe0e   :  { %2594 = vtanh.f32 %v1428_v38  ;;  %v1748_v38 = vld [vmem:[%s3152_s14 + $0x8] sm:$0xff] }
 0xe17   :  { %v2593_v34 = vpop.eup %2592 }
 0xe18   :  { %v1432_v39 = vadd.f32 1.0, %v2593_v34  ;;  %v2595_v41 = vpop.eup %2594 }
 0xe1a   :  { %2596 = vrcp.f32 %v1432_v39  ;;  %v1750_v39 = vld [vmem:[%s3152_s14 + $0x18] sm:$0xff] }
 0xe1b   :  { %2598 = vpow2.f32 %v1874_v44 }
 0xe24   :  { %v2597_v46 = vpop.eup %2596 }
 0xe25   :  { %v1446_v43 = vmul.f32 %v2597_v46, %v2595_v41  ;;  %v1445_v47 = vmul.f32 %v2597_v46, %v1443_v42  ;;  %v2599_v48 = vpop.eup %2598 }
 0xe26   :  { %v1439_v49 = vadd.f32 1.0, %v2599_v48  ;;  %v1751_v48 = vld [vmem:[%s3152_s14 + $0x20] sm:$0xff] }
 0xe27   :  { %1448 = vrot.lane.b32.xlu0 %v1446_v43, %s2629_s10 }
 0xe28   :  { %2600 = vrcp.f32 %v1439_v49  ;;  %v1752_v49 = vld [vmem:[%s3152_s14 + $0x28] sm:$0xff] }
 0xe32   :  { %v2601_v52 = vpop.eup %2600 }
 0xe99   :  { %v1449_v50 = vpop.permute.xlu0 %1448 }
 0xe9a   :  { %v1451_v51 = vadd.f32 %v1449_v50, %v1445_v47  ;;  %v2426_v50 = vpack.c.bf16 %v1752_v49, %v1751_v48 }
 0xe9c   :  { %2602 = vtanh.f32 %v1451_v51  ;;  %v1553_v1 = vrot.slane %v1451_v51, 6  ;;  %v1753_v51 = vld [vmem:[%s3152_s14 + $0x30] sm:$0xff] }
 0xea6   :  { %v2603_v53 = vpop.eup %2602 }
 0xea7   :  { %v1453_v54 = vmul.f32 %v2603_v53, %v2601_v52  ;;  %v1754_v52 = vld [vmem:[%s3152_s14 + $0x38] sm:$0xff] }
 0xea8   :  { %v2430_v53 = vpack.c.bf16 %v1754_v52, %v1753_v51 }
 0xea9   :  { %v1455_v55 = vrot.slane %v1453_v54, 2 }
 0xeab   :  { %1456 = vrot.lane.b32.xlu1 %v1455_v55, %s2629_s10 }
 0xf1d   :  { %v3068_v56 = vpop.permute.xlu1 %1456 }
 0xf1e   :  { %1875 = vmatmul.mubr.msk.f32.vlgmr.msra.gmra.mrb[12].mxu1 %vm387_vm4, %v3068_v56 }
 0xff1   :  { %v1526_v57 = vpop.f32.mrb[12].mxu1 }
 0xff2   :  { %v1533_v36 = vrot.slane %v1526_v57, 4  ;;  %v1528_v58 = vpop.f32.mrb[13].mxu1 }
 0xff3   :  { %v1534_v60 = vrot.slane %v1528_v58, 4  ;;  %v754_v58 = vld [vmem:[%s3153_s13] sm:$0x1] }
 0xff4   :  { %v1537_v31 = vadd.f32 %v1533_v36, %v2965_v3 }
 0xff5   :  { %v1538_v12 = vadd.f32 %v1534_v60, %v2969_v6 }
 0xff6   :  { %v1876_v59 = vmul.f32 -1.442695, %v1537_v31  ;;  %v1682_v31 = vsub.f32 1.0, %v754_v58 }
 0xff7   :  { %v1877_v14 = vmul.f32 -1.442695, %v1538_v12 }
 0xff8   :  { %2604 = vpow2.f32 %v1876_v59  ;;  %v1678_v59 = vrot.slane %v754_v58, %v2777_v27  ;;  %v1687_v60 = vrot.slane %v1682_v31, %v2777_v27 }
 0xff9   :  { %2606 = vtanh.f32 %v1538_v12 }
 0xffa   :  { %v1714_v12 = vmul.f32 %v1678_v59, %v3068_v56  ;;  %v1707_v27 = vmul.f32 %v1678_v59, %v3036_v0 }
0x1002   :  { %v2605_v61 = vpop.eup %2604 }
0x1003   :  { %v1542_v62 = vadd.f32 1.0, %v2605_v61  ;;  %v2607_v63 = vpop.eup %2606 }
0x1005   :  { %2608 = vrcp.f32 %v1542_v62  ;;  %v1715_v62 = vmul.f32 %v1687_v60, %v3019_v32 }
0x1006   :  { %2610 = vpow2.f32 %v1877_v14 }
0x1007   :  { %v1716_v14 = vadd.f32 %v1715_v62, %v1714_v12 }
0x100f   :  { %v2609_v4 = vpop.eup %2608 }
0x1010   :  { %v1556_v5 = vmul.f32 %v2609_v4, %v2607_v63  ;;  %v1555_v13 = vmul.f32 %v2609_v4, %v1553_v1  ;;  %v2611_v15 = vpop.eup %2610  ;;  %v1718_v1 = vmul.f32 %v1687_v60, %v3002_v2  ;;  %v1704_v4 = vmul.f32 %v1687_v60, %v3068_v56 }
0x1011   :  { %v1549_v3 = vadd.f32 1.0, %v2611_v15  ;;  %v1702_v15 = vmul.f32 %v1678_v59, %v3019_v32 }
0x1012   :  { %1558 = vrot.lane.b32.xlu0 %v1556_v5, %s2629_s10  ;;  %v1697_v5 = vmul.f32 %v1678_v59, %v3002_v2 }
0x1013   :  { %2612 = vrcp.f32 %v1549_v3  ;;  %v1705_v56 = vadd.f32 %v1704_v4, %v1702_v15 }
0x101d   :  { %v2613_v6 = vpop.eup %2612 }
0x1084   :  { %v1559_v40 = vpop.permute.xlu0 %1558 }
0x1085   :  { %v1561_v16 = vadd.f32 %v1559_v40, %v1555_v13  ;;  %v1709_v13 = vmul.f32 %v1687_v60, %v3052_v11  ;;  %v1711_v40 = vmul.f32 %v1678_v59, %v3052_v11 }
0x1087   :  { %2614 = vtanh.f32 %v1561_v16  ;;  %v1663_v29 = vrot.slane %v1561_v16, 6  ;;  %v1710_v2 = vadd.f32 %v1709_v13, %v1707_v27 }
0x1089   :  { %v1730_v11 = vrot.slane %v1710_v2, 2 }
0x1091   :  { %v2615_v17 = vpop.eup %2614 }
0x1092   :  { %v1563_v18 = vmul.f32 %v2615_v17, %v2613_v6  ;;  %v1681_v6 = vmul.f32 %v1678_v59, %v2985_v30  ;;  %v1721_v17 = vmul.f32 %v1687_v60, %v2985_v30 }
0x1094   :  { %v1565_v19 = vrot.slane %v1563_v18, 4  ;;  %v1712_v18 = vmul.f32 %v1687_v60, %v3036_v0 }
0x1096   :  { %1566 = vrot.lane.b32.xlu1 %v1565_v19, %s2629_s10  ;;  %v1713_v32 = vadd.f32 %v1712_v18, %v1711_v40 }
0x1108   :  { %v1567_v20 = vpop.permute.xlu1 %1566 }
0x1109   :  { %1878 = vmatmul.mubr.msk.f32.vlgmr.msra.gmra.mrb[12].mxu0 %vm387_vm4, %v1567_v20  ;;  %v1717_v61 = vmul.f32 %v1678_v59, %v1567_v20  ;;  %v1699_v63 = vmul.f32 %v1687_v60, %v1567_v20  ;;  %v1733_v20 = vrot.slane %v1716_v14, 6 }
0x110b   :  { %v1719_v3 = vadd.f32 %v1718_v1, %v1717_v61  ;;  %v1700_v16 = vadd.f32 %v1699_v63, %v1697_v5  ;;  %v1744_v30 = vsel %vm283_vm2, %v1713_v32, %v1733_v20 }
0x11dc   :  { %v1636_v21 = vpop.f32.mrb[12].mxu0 }
0x11dd   :  { %v1643_v22 = vrot.slane %v1636_v21, 2  ;;  %v1638_v23 = vpop.f32.mrb[13].mxu0 }
0x11de   :  { %v1644_v10 = vrot.slane %v1638_v23, 2  ;;  %v1736_v23 = vrot.slane %v1719_v3, 4 }
0x11df   :  { %v1647_v26 = vadd.f32 %v1643_v22, %v2967_v28  ;;  %v1747_v28 = vld [vmem:[%s3152_s14] sm:$0xff] }
0x11e0   :  { %v1648_v7 = vadd.f32 %v1644_v10, %v2971_v9  ;;  %v1749_v9 = vld [vmem:[%s3152_s14 + $0x10] sm:$0xff]  ;;  %v2418_v34 = vpack.c.bf16 %v1748_v38, %v1747_v28 }
0x11e1   :  { %v1879_v45 = vmul.f32 -1.442695, %v1647_v26  ;;  %v2422_v41 = vpack.c.bf16 %v1750_v39, %v1749_v9  ;;  %v1724_v26 = vrot.slane %v1700_v16, 6 }
0x11e2   :  { %2419 = vmatprep.subr.bf16.mxu1 %v2418_v34  ;;  %v1880_v42 = vmul.f32 -1.442695, %v1648_v7 }
0x11e3   :  { %2616 = vpow2.f32 %v1879_v45  ;;  %2421 = vmatpush3.bf16.msra.mxu1 %v2418_v34 }
0x11e4   :  { %2618 = vtanh.f32 %v1648_v7  ;;  %2423 = vmatprep.subr.bf16.mxu1 %v2422_v41  ;;  %v1727_v7 = vrot.slane %v1705_v56, 4 }
0x11e7   :  { %2425 = vmatpush3.bf16.msra.mxu1 %v2422_v41 }
0x11e8   :  { %2427 = vmatprep.subr.bf16.mxu1 %v2426_v50 }
0x11eb   :  { %2429 = vmatpush3.bf16.msra.mxu1 %v2426_v50 }
0x11ec   :  { %2431 = vmatprep.subr.bf16.mxu1 %v2430_v53 }
0x11ed   :  { %v2617_v8 = vpop.eup %2616 }
0x11ee   :  { %v1652_v24 = vadd.f32 1.0, %v2617_v8  ;;  %v2619_v25 = vpop.eup %2618 }
0x11ef   :  { %2433 = vmatpush3.bf16.msra.mxu1 %v2430_v53 }
0x11f0   :  { %2620 = vrcp.f32 %v1652_v24 }
0x11f1   :  { %2622 = vpow2.f32 %v1880_v42 }
0x11fa   :  { %v2621_v33 = vpop.eup %2620 }
0x11fb   :  { %v1666_v37 = vmul.f32 %v2621_v33, %v2619_v25  ;;  %v1665_v35 = vmul.f32 %v2621_v33, %v1663_v29  ;;  %v2623_v46 = vpop.eup %2622  ;;  %v1745_v25 = vsel %vm268_vm1, %v1744_v30, %v1736_v23 }
0x11fc   :  { %v1659_v43 = vadd.f32 1.0, %v2623_v46 }
0x11fd   :  { %1668 = vrot.lane.b32.xlu0 %v1666_v37, %s2629_s10  ;;  %v1881_v37 = vld [vmem:[%s3154_s15] ss:$0 sm:$0xff] }
0x11fe   :  { %2624 = vrcp.f32 %v1659_v43 }
0x1208   :  { %v2625_v54 = vpop.eup %2624 }
0x126f   :  { %v1669_v47 = vpop.permute.xlu0 %1668 }
0x1270   :  { %v1671_v44 = vadd.f32 %v1669_v47, %v1665_v35 }
0x1272   :  { %2626 = vtanh.f32 %v1671_v44 }
0x127c   :  { %v2627_v55 = vpop.eup %2626 }
0x127d   :  { %v1673_v57 = vmul.f32 %v2627_v55, %v2625_v54 }
0x127f   :  { %v1690_v36 = vrot.slane %v1673_v57, 6 }
0x1281   :  { %1691 = vrot.lane.b32.xlu1 %v1690_v36, %s2629_s10 }
0x12f3   :  { %v1692_v19 = vpop.permute.xlu1 %1691 }
0x12f4   :  { %v1694_v21 = vmul.f32 %v1692_v19, %v1687_v60  ;;  %v1720_v22 = vmul.f32 %v1692_v19, %v1678_v59 }
0x12f6   :  { %v1695_v45 = vadd.f32 %v1694_v21, %v1681_v6  ;;  %v1722_v10 = vadd.f32 %v1721_v17, %v1720_v22 }
0x12f8   :  { %v1739_v8 = vrot.slane %v1722_v10, 2  ;;  %v1741_v24 = vsel %vm283_vm2, %v1695_v45, %v1724_v26 }
0x12f9   :  { %v1742_v0 = vsel %vm268_vm1, %v1741_v24, %v1727_v7 }
0x12fa   :  { %v1743_v29 = vsel %vm306_vm3, %v1742_v0, %v1730_v11  ;;  %v1746_v33 = vsel %vm306_vm3, %v1745_v25, %v1739_v8 }
0x12fb   :  { %2179 = vmatprep.mubr.msk.f32.mxu1 %vm387_vm4, %v1743_v29 }
0x12fc   :  { %2180 = vmatmul.mubr.msk.f32.vlgmr.msra.gmra.mrb[14].mxu1 %vm387_vm4, %v1746_v33 }
0x13cf   :  { %v2181_v35 = vpop.f32.mrb[14].mxu1 }
0x13d0   :  { %v1840_v28 = vadd.f32 %v2181_v35, %v1881_v37  ;;  %v1834_v38 = vpop.f32.mrb[15].mxu1 }
0x13d1   :  { %v1835_v9 = vadd.f32 %v1881_v37, %v1834_v38 }
0x13d2   :  { %1845 = vst.msk [vmem:[%s3155_s16 + $0x8] sm:$0xff] %vm1843_vm5, %v1840_v28 }
0x13d3   :  { %1844 = vst.msk [vmem:[%s3155_s16] sm:$0xff] %vm1843_vm5, %v1835_v9 }

</bundles_post_ra>
